<compile_context>
chip_gen: v6e
topology: v6e:2x2x1
jax: 0.10.0
libtpu: 0.0.40
codegen_flags: <defaults>
</compile_context>

<pallas_src>
import functools

import jax
import jax.numpy as jnp
from jax import lax
from jax.experimental import pallas as pl
from jax.experimental.pallas import tpu as pltpu


def _round_up(x, m):
    return ((x + m - 1) // m) * m


def _time_reduction_kernel(lens_ref, x_ref, w_ref, b_ref, o_ref, col_ref, halo_ref,
                           *, kernel_size, stride, halo, d, d_pad, t_in_tile,
                           t_out_tile):
    # lens_ref : (B,) int32, SMEM (scalar prefetch)  valid length per sequence
    # x_ref    : (t_in_tile, d)        current input time tile (batch squeezed)
    # w_ref    : (K*d_pad, ot)         folded depthwise*pointwise weights, flat
    # b_ref    : (1, ot)               fused bias (dw_b @ pw_w + pw_b), f32
    # o_ref    : (t_out_tile, ot)      output tile (one out-dim slab)
    # col_ref  : (t_out_tile, K*d_pad) VMEM im2col scratch
    # halo_ref : (max(halo,1), d)      masked tail of the previous input tile
    b = pl.program_id(1)
    i = pl.program_id(2)                 # time tile index (innermost, sequential)
    length = lens_ref[b]
    base = i * t_in_tile                 # nominal global row of x_ref row 0

    # Once per (out-slab, batch) sequence: reset the halo (== the conv's left
    # zero padding) and clear the never-rewritten lane-padding columns of the
    # im2col scratch (their weight rows are zero, but stale VMEM could be NaN).
    @pl.when(i == 0)
    def _init():
        if halo > 0:
            halo_ref[...] = jnp.zeros_like(halo_ref)
        if d_pad > d:
            for k in range(kernel_size):
                col_ref[:, pl.ds(k * d_pad + d, d_pad - d)] = jnp.zeros(
                    (t_out_tile, d_pad - d), col_ref.dtype)

    # Nominal global position of local input row t*stride, per output row t.
    rows = base + stride * lax.broadcasted_iota(jnp.int32, (t_out_tile, 1), 0)

    # im2col: column block k of row t holds x[(i*tt + t)*stride - halo + k]
    # (masked).  Bulk comes straight from x_ref — one strided masked read per
    # tap, no full-tile staging copy — and only the first t0 rows per tap come
    # from the carried halo.
    # TODO(synk): if the stride-S sublane reads prove costly in the bundle dump,
    # deinterleave x once into `stride` parity planes instead.
    for k in range(kernel_size):
        off = k - halo                   # local input-row offset of tap k
        t0 = (-off + stride - 1) // stride if off < 0 else 0
        n = t_out_tile - t0
        start = t0 * stride + off        # first in-tile row of this tap, >= 0
        xk = x_ref[pl.ds(start, n, stride=stride), :]
        # pad_mask fill + conv right zero pad + garbage tail of clamped blocks:
        # the position feeding output row t is rows[t] + (k - halo).
        xk = jnp.where(rows[t0:, :] < length + (halo - k), xk,
                       jnp.zeros((), xk.dtype))
        col_ref[pl.ds(t0, n), pl.ds(k * d_pad, d)] = xk
        for t in range(t0):              # <= ceil(halo/stride) tiny row copies
            col_ref[pl.ds(t, 1), pl.ds(k * d_pad, d)] = (
                halo_ref[pl.ds(t * stride + k, 1), :])

    # Carry the (masked) last `halo` input rows of this tile to the next one.
    if halo > 0:
        tpos = (base + t_in_tile - halo
                + lax.broadcasted_iota(jnp.int32, (halo, 1), 0))
        tail = x_ref[pl.ds(t_in_tile - halo, halo), :]
        halo_ref[...] = jnp.where(tpos < length, tail, jnp.zeros((), tail.dtype))

    # Single MXU matmul per tile, f32 accumulation over the (tap, channel) axis.
    acc = jnp.dot(col_ref[...], w_ref[...], preferred_element_type=jnp.float32)
    o_ref[...] = (acc + b_ref[...]).astype(o_ref.dtype)


def time_reduction_forward(x, dw_w, dw_b, pw_w, pw_b,
                           att_mask=None, pad_mask=None,
                           kernel_size=5, stride=2,
                           time_tile=512, out_slab=512, out_dtype=None):
    """Pallas TimeReductionModule.forward.

    x     : (B, T, d_model)    -- the module's (B, T, D) input (pre-transpose)
    dw_w  : (K, d_model)       -- torch dw_conv.weight[d, 0, k] -> [k, d]
    dw_b  : (d_model,)
    pw_w  : (d_model, out_dim) -- torch pw_conv.weight[o, d, 0] -> [d, o]
    pw_b  : (out_dim,)
    """
    B, T, D = x.shape
    out_dim = pw_w.shape[1]
    if out_dtype is None:
        out_dtype = x.dtype              # bf16 in -> bf16 out (halves writeback)
    halo = max(0, kernel_size - stride)  # == conv "padding"
    t_out = (T + 2 * halo - kernel_size) // stride + 1
    assert t_out > 0

    # Per-sequence valid lengths (the pad_mask fill happens inside the kernel).
    # TODO(synk): this assumes a right-padded (suffix) pad_mask as produced by
    # NeMo's length-based masks; an arbitrary boolean mask would have to be
    # streamed into the kernel as a (B, T, 1) tensor instead.
    if pad_mask is not None:
        lengths = T - jnp.sum(pad_mask.astype(jnp.int32), axis=-1)
        lengths = jnp.minimum(lengths, T).astype(jnp.int32)
    else:
        lengths = jnp.full((B,), T, dtype=jnp.int32)

    w_dtype = x.dtype if x.dtype in (jnp.bfloat16, jnp.float32) else jnp.float32

    # Lane-aligned im2col column blocks and lane-dense output slabs.
    # TODO(synk): for d_model far from a multiple of 128 (e.g. 144) the per-tap
    # pad inflates the MXU contraction; an unpadded (lane-rotated) im2col may win.
    d_pad = _round_up(D, 128)
    op_total = _round_up(out_dim, 128)
    ot = min(op_total, max(128, _round_up(out_slab, 128)))
    n_op = pl.cdiv(op_total, ot)
    op_total = n_op * ot

    # Fold depthwise into pointwise and flatten over (tap, channel):
    #   z = (sum_k x_k * dw_k + dw_b) @ PW + pw_b
    #     = im2col(x) @ W_flat + bias,  W_flat[k*Dp + d, :] = dw[k, d] * PW[d, :]
    wf = (dw_w.astype(jnp.float32)[:, :, None] *
          pw_w.astype(jnp.float32)[None, :, :])                 # (K, D, out_dim)
    wf = jnp.pad(wf, ((0, 0), (0, d_pad - D), (0, op_total - out_dim)))
    wf = wf.reshape(kernel_size * d_pad, op_total).astype(w_dtype)
    bf = (dw_b.astype(jnp.float32) @ pw_w.astype(jnp.float32)
          + pw_b.astype(jnp.float32))
    bf = jnp.pad(bf, ((0, op_total - out_dim),)).reshape(1, op_total)
    bf = bf.astype(jnp.float32)

    # Time tiling: tt output rows per grid step.
    tt = max(8, _round_up(min(time_tile, t_out), 8))
    t_in_tile = tt * stride
    nt = pl.cdiv(t_out, tt)
    n_in_blocks = pl.cdiv(T, t_in_tile)
    assert (halo + stride - 1) // stride < tt

    kernel = functools.partial(
        _time_reduction_kernel,
        kernel_size=kernel_size, stride=stride, halo=halo,
        d=D, d_pad=d_pad, t_in_tile=t_in_tile, t_out_tile=tt)

    # The nominal input block of the last time tile can start at/past T; clamp
    # the block index.  Correctness is preserved because in-kernel masking uses
    # the nominal position `i*t_in_tile + row`, not what was DMA'd.
    x_map = lambda s, b, i, lens: (b, jnp.minimum(i, n_in_blocks - 1), 0)
    w_map = lambda s, b, i, lens: (0, s)
    bias_map = lambda s, b, i, lens: (0, s)
    o_map = lambda s, b, i, lens: (b, i, s)

    # VMEM budget derived from the per-step footprint (v7x: 64 MiB / TC).
    xb = jnp.dtype(x.dtype).itemsize
    wb = jnp.dtype(w_dtype).itemsize
    ob = jnp.dtype(out_dtype).itemsize
    footprint = (2 * t_in_tile * D * xb                # x block (double-buffered)
                 + 2 * tt * ot * ob                    # out block (double-buffered)
                 + 2 * kernel_size * d_pad * ot * wb   # weights (<= double-buffered)
                 + 2 * ot * 4                          # bias
                 + tt * kernel_size * d_pad * xb       # im2col scratch
                 + max(halo, 1) * D * xb               # halo scratch
                 + tt * ot * 4)                        # f32 matmul result
    try:
        phys_vmem = pltpu.get_tpu_info().vmem_capacity_bytes
    except Exception:
        phys_vmem = 128 * 1024 * 1024
    vmem_limit = int(min(phys_vmem,
                         max(32 * 1024 * 1024, footprint * 3 // 2 + (4 << 20))))

    def _call(single_buffer_consts):
        if single_buffer_consts:
            # Constant blocks: their index only moves with the out-dim slab, so
            # a single buffer halves their VMEM residency at zero cost.
            w_spec = pl.BlockSpec((kernel_size * d_pad, ot), w_map,
                                  pipeline_mode=pl.Buffered(1))
            b_spec = pl.BlockSpec((1, ot), bias_map, pipeline_mode=pl.Buffered(1))
        else:
            w_spec = pl.BlockSpec((kernel_size * d_pad, ot), w_map)
            b_spec = pl.BlockSpec((1, ot), bias_map)
        return pl.pallas_call(
            kernel,
            out_shape=jax.ShapeDtypeStruct((B, t_out, op_total), out_dtype),
            grid_spec=pltpu.PrefetchScalarGridSpec(
                num_scalar_prefetch=1,
                # (out-slab, batch, time): out-slab outermost so a weight slab
                # stays VMEM-resident across the whole batch; time innermost and
                # sequential because the halo scratch is carried across it.
                grid=(n_op, B, nt),
                in_specs=[pl.BlockSpec((None, t_in_tile, D), x_map),
                          w_spec, b_spec],
                out_specs=pl.BlockSpec((None, tt, ot), o_map),
                scratch_shapes=[
                    pltpu.VMEM((tt, kernel_size * d_pad), x.dtype),   # im2col
                    pltpu.VMEM((max(halo, 1), D), x.dtype),           # halo carry
                ]),
            compiler_params=pltpu.CompilerParams(
                # out-slab and batch are independent (v7x 2-TC sharding even at
                # B == 1); the time axis carries the halo -> "arbitrary".
                dimension_semantics=("parallel", "parallel", "arbitrary"),
                vmem_limit_bytes=vmem_limit),
        )(lengths, x, wf, bf)

    try:
        raw = _call(True)
    except Exception:
        # TODO(synk): pl.Buffered(1) single-buffering unsupported on this jax
        # version; fall back to default double buffering (costs VMEM only).
        raw = _call(False)

    new_att, new_pad = att_mask, pad_mask
    if att_mask is not None and pad_mask is not None:
        new_att = att_mask[:, ::stride, ::stride]
        new_pad = pad_mask[:, ::stride]
        L = new_pad.shape[-1]
    else:
        L = t_out

    # Single slice removes the out_dim lane padding and performs the time
    # truncation of torch's F.pad(x, (0, 0, 0, L - T)); pad if L > t_out.
    out = raw[:, :min(L, t_out), :out_dim]
    if L > t_out:
        out = jnp.pad(out, ((0, 0), (0, L - t_out), (0, 0)))
    return out, new_att, new_pad


def _reference(x, dw_w, dw_b, pw_w, pw_b, att_mask, pad_mask, kernel_size, stride):
    """Pure-JAX mirror of the PyTorch module's forward (for checking)."""
    xf = x.astype(jnp.float32)
    if pad_mask is not None:
        xf = jnp.where(pad_mask[:, :, None], 0.0, xf)
    P = max(0, kernel_size - stride)
    xp = jnp.pad(xf, ((0, 0), (P, P), (0, 0)))
    t_out = (xp.shape[1] - kernel_size) // stride + 1
    y = jnp.zeros((x.shape[0], t_out, x.shape[2]), jnp.float32)
    for k in range(kernel_size):
        y = y + xp[:, k:k + stride * (t_out - 1) + 1:stride, :] \
            * dw_w.astype(jnp.float32)[k][None, None, :]
    y = y + dw_b.astype(jnp.float32)[None, None, :]
    z = jnp.einsum("btd,do->bto", y, pw_w.astype(jnp.float32)) \
        + pw_b.astype(jnp.float32)[None, None, :]
    if att_mask is not None and pad_mask is not None:
        att_mask = att_mask[:, ::stride, ::stride]
        pad_mask = pad_mask[:, ::stride]
        L = pad_mask.shape[-1]
        if L >= t_out:
            z = jnp.pad(z, ((0, 0), (0, L - t_out), (0, 0)))
        else:
            z = z[:, :L, :]
    return z, att_mask, pad_mask


if __name__ == "__main__":
    key = jax.random.PRNGKey(0)

    def make_params(k, d_model, out_dim, kernel_size):
        kdw, kdb, kpw, kpb = jax.random.split(k, 4)
        dw_max = kernel_size ** (-0.5)
        pw_max = d_model ** (-0.5)
        dw_w = jax.random.uniform(kdw, (kernel_size, d_model),
                                  minval=-dw_max, maxval=dw_max, dtype=jnp.float32)
        dw_b = jax.random.uniform(kdb, (d_model,),
                                  minval=-dw_max, maxval=dw_max, dtype=jnp.float32)
        pw_w = jax.random.uniform(kpw, (d_model, out_dim),
                                  minval=-pw_max, maxval=pw_max, dtype=jnp.float32)
        pw_b = jax.random.uniform(kpb, (out_dim,),
                                  minval=-pw_max, maxval=pw_max, dtype=jnp.float32)
        return dw_w, dw_b, pw_w, pw_b

    # --- test 1: masks, multiple time tiles, halo carry, clipped boundary blocks
    B, T, D, OUT, K, S = 2, 20, 32, 32, 5, 2
    k1, k2, key = jax.random.split(key, 3)
    x = jax.random.normal(k1, (B, T, D), dtype=jnp.float32)
    dw_w, dw_b, pw_w, pw_b = make_params(k2, D, OUT, K)
    lengths = jnp.array([20, 13])
    pad_mask = jnp.arange(T)[None, :] >= lengths[:, None]
    valid = ~pad_mask
    att_mask = valid[:, :, None] & valid[:, None, :]

    out, am, pm = time_reduction_forward(
        x, dw_w, dw_b, pw_w, pw_b, att_mask=att_mask, pad_mask=pad_mask,
        kernel_size=K, stride=S, time_tile=8)
    out = jax.block_until_ready(out)
    ref, ram, rpm = _reference(x, dw_w, dw_b, pw_w, pw_b, att_mask, pad_mask, K, S)
    assert out.shape == ref.shape and am.shape == ram.shape and pm.shape == rpm.shape
    assert jnp.allclose(out, ref, atol=5e-3, rtol=5e-3)
    assert jnp.array_equal(am, ram) and jnp.array_equal(pm, rpm)

    # --- test 2: no masks, out_dim not a multiple of 128 (lane-padding path)
    B, T, D, OUT, K, S = 2, 16, 32, 48, 5, 2
    k1, k2, key = jax.random.split(key, 3)
    x = jax.random.normal(k1, (B, T, D), dtype=jnp.float32)
    dw_w, dw_b, pw_w, pw_b = make_params(k2, D, OUT, K)
    out, _, _ = time_reduction_forward(x, dw_w, dw_b, pw_w, pw_b,
                                       kernel_size=K, stride=S, time_tile=32)
    out = jax.block_until_ready(out)
    ref, _, _ = _reference(x, dw_w, dw_b, pw_w, pw_b, None, None, K, S)
    assert out.shape == ref.shape
    assert jnp.allclose(out, ref, atol=5e-3, rtol=5e-3)

    # --- test 3: bf16 input, out_dtype defaults to bf16 (reduced-precision path)
    B, T, D, OUT, K, S = 2, 24, 32, 32, 5, 2
    k1, k2, key = jax.random.split(key, 3)
    xb = jax.random.normal(k1, (B, T, D), dtype=jnp.float32).astype(jnp.bfloat16)
    dw_w, dw_b, pw_w, pw_b = make_params(k2, D, OUT, K)
    lengths = jnp.array([24, 17])
    pad_mask = jnp.arange(T)[None, :] >= lengths[:, None]
    valid = ~pad_mask
    att_mask = valid[:, :, None] & valid[:, None, :]
    outb, _, _ = time_reduction_forward(
        xb, dw_w, dw_b, pw_w, pw_b, att_mask=att_mask, pad_mask=pad_mask,
        kernel_size=K, stride=S, time_tile=8)
    outb = jax.block_until_ready(outb)
    refb, _, _ = _reference(xb, dw_w, dw_b, pw_w, pw_b, att_mask, pad_mask, K, S)
    assert outb.shape == refb.shape and outb.dtype == jnp.bfloat16
    assert jnp.allclose(outb.astype(jnp.float32), refb, atol=5e-2, rtol=5e-2)

    # --- test 4: out-dim slab grid axis (n_op > 1) + clamped last input block
    B, T, D, OUT, K, S = 2, 16, 32, 256, 5, 2
    k1, k2, key = jax.random.split(key, 3)
    x = jax.random.normal(k1, (B, T, D), dtype=jnp.float32)
    dw_w, dw_b, pw_w, pw_b = make_params(k2, D, OUT, K)
    out, _, _ = time_reduction_forward(x, dw_w, dw_b, pw_w, pw_b,
                                       kernel_size=K, stride=S,
                                       time_tile=8, out_slab=128)
    out = jax.block_until_ready(out)
    ref, _, _ = _reference(x, dw_w, dw_b, pw_w, pw_b, None, None, K, S)
    assert out.shape == ref.shape
    assert jnp.allclose(out, ref, atol=5e-3, rtol=5e-3)

    print("KERNEL_OK")
</pallas_src>

<mosaic_0001>
module attributes {stable_mosaic.version = 11 : i64} {
  func.func @_time_reduction_kernel(%arg0: i32, %arg1: i32, %arg2: i32, %arg3: memref<2xi32, #tpu.memory_space<smem>>, %arg4: memref<1x16x32xf32, #tpu.memory_space<vmem>>, %arg5: memref<640x128xf32, #tpu.memory_space<vmem>>, %arg6: memref<1x128xf32, #tpu.memory_space<vmem>>, %arg7: memref<1x8x128xf32, #tpu.memory_space<vmem>>, %arg8: memref<8x640xf32, #tpu.memory_space<vmem>>, %arg9: memref<3x32xf32, #tpu.memory_space<vmem>>) attributes {dimension_semantics = [#tpu.dimension_semantics<parallel>, #tpu.dimension_semantics<parallel>, #tpu.dimension_semantics<arbitrary>], iteration_bounds = array<i64: 1, 2, 2>, scalar_prefetch = 1 : i64, scratch_operands = 2 : i64, tpu.core_type = #tpu.core_type<tc>, window_params = [{transform_indices = @transform_0, window_bounds = array<i64: 1, 16, 32>}, {pipeline_mode = #tpu.pipeline_mode<synchronous>, transform_indices = @transform_1, window_bounds = array<i64: 640, 128>}, {pipeline_mode = #tpu.pipeline_mode<synchronous>, transform_indices = @transform_2, window_bounds = array<i64: 1, 128>}, {transform_indices = @transform_3, window_bounds = array<i64: 1, 8, 128>}]} {
    %0 = arith.index_cast %arg1 : i32 to index
    %1 = memref.load %arg3[%0] : memref<2xi32, #tpu.memory_space<smem>>
    %c16_i32 = arith.constant 16 : i32
    %2 = arith.muli %arg2, %c16_i32 : i32
    %c0_i32 = arith.constant 0 : i32
    %3 = arith.cmpi eq, %arg2, %c0_i32 : i32
    %4 = arith.extui %3 : i1 to i32
    %c0_i32_0 = arith.constant 0 : i32
    %5 = arith.cmpi ne, %4, %c0_i32_0 : i32
    scf.if %5 {
      %cst_58 = arith.constant 0.000000e+00 : f32
      %95 = vector.broadcast %cst_58 : f32 to vector<3x32xf32>
      %c0_59 = arith.constant 0 : index
      %c0_60 = arith.constant 0 : index
      %96 = vector.load %arg9[%c0_59, %c0_60] : memref<3x32xf32, #tpu.memory_space<vmem>>, vector<3x32xf32>
      tpu.vector_store %arg9[%c0_59, %c0_60], %95 {strides = array<i32>} : memref<3x32xf32, #tpu.memory_space<vmem>>, vector<3x32xf32>,
      %cst_61 = arith.constant 0.000000e+00 : f32
      %97 = vector.broadcast %cst_61 : f32 to vector<8x96xf32>
      %c0_62 = arith.constant 0 : index
      %c32 = arith.constant 32 : index
      %98 = vector.load %arg8[%c0_62, %c32] : memref<8x640xf32, #tpu.memory_space<vmem>>, vector<8x96xf32>
      tpu.vector_store %arg8[%c0_62, %c32], %97 {strides = array<i32>} : memref<8x640xf32, #tpu.memory_space<vmem>>, vector<8x96xf32>,
      %cst_63 = arith.constant 0.000000e+00 : f32
      %99 = vector.broadcast %cst_63 : f32 to vector<8x96xf32>
      %c0_64 = arith.constant 0 : index
      %c160 = arith.constant 160 : index
      %100 = vector.load %arg8[%c0_64, %c160] : memref<8x640xf32, #tpu.memory_space<vmem>>, vector<8x96xf32>
      tpu.vector_store %arg8[%c0_64, %c160], %99 {strides = array<i32>} : memref<8x640xf32, #tpu.memory_space<vmem>>, vector<8x96xf32>,
      %cst_65 = arith.constant 0.000000e+00 : f32
      %101 = vector.broadcast %cst_65 : f32 to vector<8x96xf32>
      %c0_66 = arith.constant 0 : index
      %c288 = arith.constant 288 : index
      %102 = vector.load %arg8[%c0_66, %c288] : memref<8x640xf32, #tpu.memory_space<vmem>>, vector<8x96xf32>
      tpu.vector_store %arg8[%c0_66, %c288], %101 {strides = array<i32>} : memref<8x640xf32, #tpu.memory_space<vmem>>, vector<8x96xf32>,
      %cst_67 = arith.constant 0.000000e+00 : f32
      %103 = vector.broadcast %cst_67 : f32 to vector<8x96xf32>
      %c0_68 = arith.constant 0 : index
      %c416 = arith.constant 416 : index
      %104 = vector.load %arg8[%c0_68, %c416] : memref<8x640xf32, #tpu.memory_space<vmem>>, vector<8x96xf32>
      tpu.vector_store %arg8[%c0_68, %c416], %103 {strides = array<i32>} : memref<8x640xf32, #tpu.memory_space<vmem>>, vector<8x96xf32>,
      %cst_69 = arith.constant 0.000000e+00 : f32
      %105 = vector.broadcast %cst_69 : f32 to vector<8x96xf32>
      %c0_70 = arith.constant 0 : index
      %c544 = arith.constant 544 : index
      %106 = vector.load %arg8[%c0_70, %c544] : memref<8x640xf32, #tpu.memory_space<vmem>>, vector<8x96xf32>
      tpu.vector_store %arg8[%c0_70, %c544], %105 {strides = array<i32>} : memref<8x640xf32, #tpu.memory_space<vmem>>, vector<8x96xf32>,
    } else {
    }
    %6 = tpu.iota {dimensions = array<i32: 0>} : vector<8x1xi32>
    %c2_i32 = arith.constant 2 : i32
    %7 = vector.broadcast %c2_i32 : i32 to vector<8x1xi32>
    %8 = arith.muli %7, %6 : vector<8x1xi32>
    %9 = vector.broadcast %2 : i32 to vector<8x1xi32>
    %10 = arith.addi %9, %8 : vector<8x1xi32>
    %c0 = arith.constant 0 : index
    %c1 = arith.constant 1 : index
    %c0_1 = arith.constant 0 : index
    %11 = tpu.strided_load %arg4[%c0, %c1, %c0_1] {strides = array<i32: 1, 2, 1>} : memref<1x16x32xf32, #tpu.memory_space<vmem>>, vector<1x6x32xf32>
    %12 = vector.shape_cast %11 : vector<1x6x32xf32> to vector<6x32xf32>
    %13 = vector.extract_strided_slice %10 {offsets = [2, 0], sizes = [6, 1], strides = [1, 1]} : vector<8x1xi32> to vector<6x1xi32>
    %c3_i32 = arith.constant 3 : i32
    %14 = arith.addi %1, %c3_i32 : i32
    %15 = vector.broadcast %14 : i32 to vector<6x1xi32>
    %16 = arith.cmpi slt, %13, %15 : vector<6x1xi32>
    %cst = arith.constant 0.000000e+00 : f32
    %17 = vector.shape_cast %16 : vector<6x1xi1> to vector<6x1xi1>
    %18 = vector.broadcast %17 : vector<6x1xi1> to vector<6x32xi1>
    %19 = vector.broadcast %cst : f32 to vector<6x32xf32>
    %20 = arith.select %18, %12, %19 : vector<6x32xi1>, vector<6x32xf32>
    %c2 = arith.constant 2 : index
    %c0_2 = arith.constant 0 : index
    %21 = vector.load %arg8[%c2, %c0_2] : memref<8x640xf32, #tpu.memory_space<vmem>>, vector<6x32xf32>
    tpu.vector_store %arg8[%c2, %c0_2], %20 {strides = array<i32>} : memref<8x640xf32, #tpu.memory_space<vmem>>, vector<6x32xf32>,
    %c0_3 = arith.constant 0 : index
    %c0_4 = arith.constant 0 : index
    %22 = vector.load %arg9[%c0_3, %c0_4] : memref<3x32xf32, #tpu.memory_space<vmem>>, vector<1x32xf32>
    %c0_5 = arith.constant 0 : index
    %c0_6 = arith.constant 0 : index
    %23 = vector.load %arg8[%c0_5, %c0_6] : memref<8x640xf32, #tpu.memory_space<vmem>>, vector<1x32xf32>
    tpu.vector_store %arg8[%c0_5, %c0_6], %22 {strides = array<i32>} : memref<8x640xf32, #tpu.memory_space<vmem>>, vector<1x32xf32>,
    %c2_7 = arith.constant 2 : index
    %c0_8 = arith.constant 0 : index
    %24 = vector.load %arg9[%c2_7, %c0_8] : memref<3x32xf32, #tpu.memory_space<vmem>>, vector<1x32xf32>
    %c1_9 = arith.constant 1 : index
    %c0_10 = arith.constant 0 : index
    %25 = vector.load %arg8[%c1_9, %c0_10] : memref<8x640xf32, #tpu.memory_space<vmem>>, vector<1x32xf32>
    tpu.vector_store %arg8[%c1_9, %c0_10], %24 {strides = array<i32>} : memref<8x640xf32, #tpu.memory_space<vmem>>, vector<1x32xf32>,
    %c0_11 = arith.constant 0 : index
    %c0_12 = arith.constant 0 : index
    %c0_13 = arith.constant 0 : index
    %26 = tpu.strided_load %arg4[%c0_11, %c0_12, %c0_13] {strides = array<i32: 1, 2, 1>} : memref<1x16x32xf32, #tpu.memory_space<vmem>>, vector<1x7x32xf32>
    %27 = vector.shape_cast %26 : vector<1x7x32xf32> to vector<7x32xf32>
    %28 = vector.extract_strided_slice %10 {offsets = [1, 0], sizes = [7, 1], strides = [1, 1]} : vector<8x1xi32> to vector<7x1xi32>
    %c2_i32_14 = arith.constant 2 : i32
    %29 = arith.addi %1, %c2_i32_14 : i32
    %30 = vector.broadcast %29 : i32 to vector<7x1xi32>
    %31 = arith.cmpi slt, %28, %30 : vector<7x1xi32>
    %cst_15 = arith.constant 0.000000e+00 : f32
    %32 = vector.shape_cast %31 : vector<7x1xi1> to vector<7x1xi1>
    %33 = vector.broadcast %32 : vector<7x1xi1> to vector<7x32xi1>
    %34 = vector.broadcast %cst_15 : f32 to vector<7x32xf32>
    %35 = arith.select %33, %27, %34 : vector<7x32xi1>, vector<7x32xf32>
    %c1_16 = arith.constant 1 : index
    %c128 = arith.constant 128 : index
    %36 = vector.load %arg8[%c1_16, %c128] : memref<8x640xf32, #tpu.memory_space<vmem>>, vector<7x32xf32>
    tpu.vector_store %arg8[%c1_16, %c128], %35 {strides = array<i32>} : memref<8x640xf32, #tpu.memory_space<vmem>>, vector<7x32xf32>,
    %c1_17 = arith.constant 1 : index
    %c0_18 = arith.constant 0 : index
    %37 = vector.load %arg9[%c1_17, %c0_18] : memref<3x32xf32, #tpu.memory_space<vmem>>, vector<1x32xf32>
    %c0_19 = arith.constant 0 : index
    %c128_20 = arith.constant 128 : index
    %38 = vector.load %arg8[%c0_19, %c128_20] : memref<8x640xf32, #tpu.memory_space<vmem>>, vector<1x32xf32>
    tpu.vector_store %arg8[%c0_19, %c128_20], %37 {strides = array<i32>} : memref<8x640xf32, #tpu.memory_space<vmem>>, vector<1x32xf32>,
    %c0_21 = arith.constant 0 : index
    %c1_22 = arith.constant 1 : index
    %c0_23 = arith.constant 0 : index
    %39 = tpu.strided_load %arg4[%c0_21, %c1_22, %c0_23] {strides = array<i32: 1, 2, 1>} : memref<1x16x32xf32, #tpu.memory_space<vmem>>, vector<1x7x32xf32>
    %40 = vector.shape_cast %39 : vector<1x7x32xf32> to vector<7x32xf32>
    %41 = vector.extract_strided_slice %10 {offsets = [1, 0], sizes = [7, 1], strides = [1, 1]} : vector<8x1xi32> to vector<7x1xi32>
    %c1_i32 = arith.constant 1 : i32
    %42 = arith.addi %1, %c1_i32 : i32
    %43 = vector.broadcast %42 : i32 to vector<7x1xi32>
    %44 = arith.cmpi slt, %41, %43 : vector<7x1xi32>
    %cst_24 = arith.constant 0.000000e+00 : f32
    %45 = vector.shape_cast %44 : vector<7x1xi1> to vector<7x1xi1>
    %46 = vector.broadcast %45 : vector<7x1xi1> to vector<7x32xi1>
    %47 = vector.broadcast %cst_24 : f32 to vector<7x32xf32>
    %48 = arith.select %46, %40, %47 : vector<7x32xi1>, vector<7x32xf32>
    %c1_25 = arith.constant 1 : index
    %c256 = arith.constant 256 : index
    %49 = vector.load %arg8[%c1_25, %c256] : memref<8x640xf32, #tpu.memory_space<vmem>>, vector<7x32xf32>
    tpu.vector_store %arg8[%c1_25, %c256], %48 {strides = array<i32>} : memref<8x640xf32, #tpu.memory_space<vmem>>, vector<7x32xf32>,
    %c2_26 = arith.constant 2 : index
    %c0_27 = arith.constant 0 : index
    %50 = vector.load %arg9[%c2_26, %c0_27] : memref<3x32xf32, #tpu.memory_space<vmem>>, vector<1x32xf32>
    %c0_28 = arith.constant 0 : index
    %c256_29 = arith.constant 256 : index
    %51 = vector.load %arg8[%c0_28, %c256_29] : memref<8x640xf32, #tpu.memory_space<vmem>>, vector<1x32xf32>
    tpu.vector_store %arg8[%c0_28, %c256_29], %50 {strides = array<i32>} : memref<8x640xf32, #tpu.memory_space<vmem>>, vector<1x32xf32>,
    %c0_30 = arith.constant 0 : index
    %c0_31 = arith.constant 0 : index
    %c0_32 = arith.constant 0 : index
    %52 = tpu.strided_load %arg4[%c0_30, %c0_31, %c0_32] {strides = array<i32: 1, 2, 1>} : memref<1x16x32xf32, #tpu.memory_space<vmem>>, vector<1x8x32xf32>
    %53 = vector.shape_cast %52 : vector<1x8x32xf32> to vector<8x32xf32>
    %c0_i32_33 = arith.constant 0 : i32
    %54 = arith.addi %1, %c0_i32_33 : i32
    %55 = vector.broadcast %54 : i32 to vector<8x1xi32>
    %56 = arith.cmpi slt, %10, %55 : vector<8x1xi32>
    %cst_34 = arith.constant 0.000000e+00 : f32
    %57 = vector.shape_cast %56 : vector<8x1xi1> to vector<8x1xi1>
    %58 = vector.broadcast %57 : vector<8x1xi1> to vector<8x32xi1>
    %59 = vector.broadcast %cst_34 : f32 to vector<8x32xf32>
    %60 = arith.select %58, %53, %59 : vector<8x32xi1>, vector<8x32xf32>
    %c0_35 = arith.constant 0 : index
    %c384 = arith.constant 384 : index
    %61 = vector.load %arg8[%c0_35, %c384] : memref<8x640xf32, #tpu.memory_space<vmem>>, vector<8x32xf32>
    tpu.vector_store %arg8[%c0_35, %c384], %60 {strides = array<i32>} : memref<8x640xf32, #tpu.memory_space<vmem>>, vector<8x32xf32>,
    %c0_36 = arith.constant 0 : index
    %c1_37 = arith.constant 1 : index
    %c0_38 = arith.constant 0 : index
    %62 = tpu.strided_load %arg4[%c0_36, %c1_37, %c0_38] {strides = array<i32: 1, 2, 1>} : memref<1x16x32xf32, #tpu.memory_space<vmem>>, vector<1x8x32xf32>
    %63 = vector.shape_cast %62 : vector<1x8x32xf32> to vector<8x32xf32>
    %c-1_i32 = arith.constant -1 : i32
    %64 = arith.addi %1, %c-1_i32 : i32
    %65 = vector.broadcast %64 : i32 to vector<8x1xi32>
    %66 = arith.cmpi slt, %10, %65 : vector<8x1xi32>
    %cst_39 = arith.constant 0.000000e+00 : f32
    %67 = vector.shape_cast %66 : vector<8x1xi1> to vector<8x1xi1>
    %68 = vector.broadcast %67 : vector<8x1xi1> to vector<8x32xi1>
    %69 = vector.broadcast %cst_39 : f32 to vector<8x32xf32>
    %70 = arith.select %68, %63, %69 : vector<8x32xi1>, vector<8x32xf32>
    %c0_40 = arith.constant 0 : index
    %c512 = arith.constant 512 : index
    %71 = vector.load %arg8[%c0_40, %c512] : memref<8x640xf32, #tpu.memory_space<vmem>>, vector<8x32xf32>
    tpu.vector_store %arg8[%c0_40, %c512], %70 {strides = array<i32>} : memref<8x640xf32, #tpu.memory_space<vmem>>, vector<8x32xf32>,
    %c16_i32_41 = arith.constant 16 : i32
    %72 = arith.addi %2, %c16_i32_41 : i32
    %c3_i32_42 = arith.constant 3 : i32
    %73 = arith.subi %72, %c3_i32_42 : i32
    %74 = tpu.iota {dimensions = array<i32: 0>} : vector<3x1xi32>
    %75 = vector.broadcast %73 : i32 to vector<3x1xi32>
    %76 = arith.addi %75, %74 : vector<3x1xi32>
    %c0_43 = arith.constant 0 : index
    %c13 = arith.constant 13 : index
    %c0_44 = arith.constant 0 : index
    %77 = vector.load %arg4[%c0_43, %c13, %c0_44] : memref<1x16x32xf32, #tpu.memory_space<vmem>>, vector<1x3x32xf32>
    %78 = vector.shape_cast %77 : vector<1x3x32xf32> to vector<3x32xf32>
    %79 = vector.broadcast %1 : i32 to vector<3x1xi32>
    %80 = arith.cmpi slt, %76, %79 : vector<3x1xi32>
    %cst_45 = arith.constant 0.000000e+00 : f32
    %81 = vector.shape_cast %80 : vector<3x1xi1> to vector<3x1xi1>
    %82 = vector.broadcast %81 : vector<3x1xi1> to vector<3x32xi1>
    %83 = vector.broadcast %cst_45 : f32 to vector<3x32xf32>
    %84 = arith.select %82, %78, %83 : vector<3x32xi1>, vector<3x32xf32>
    %c0_46 = arith.constant 0 : index
    %c0_47 = arith.constant 0 : index
    %85 = vector.load %arg9[%c0_46, %c0_47] : memref<3x32xf32, #tpu.memory_space<vmem>>, vector<3x32xf32>
    tpu.vector_store %arg9[%c0_46, %c0_47], %84 {strides = array<i32>} : memref<3x32xf32, #tpu.memory_space<vmem>>, vector<3x32xf32>,
    %c0_48 = arith.constant 0 : index
    %c0_49 = arith.constant 0 : index
    %86 = vector.load %arg8[%c0_48, %c0_49] : memref<8x640xf32, #tpu.memory_space<vmem>>, vector<8x640xf32>
    %c0_50 = arith.constant 0 : index
    %c0_51 = arith.constant 0 : index
    %87 = vector.load %arg5[%c0_50, %c0_51] : memref<640x128xf32, #tpu.memory_space<vmem>>, vector<640x128xf32>
    %cst_52 = arith.constant dense<0.000000e+00> : vector<8x128xf32>
    %88 = tpu.matmul %86, %87, %cst_52 {dimension_numbers = #tpu.dot_dimension_numbers<[1], [0], [0], [1], [0, 0, 1, 1], [], []>} : vector<8x640xf32>, vector<640x128xf32>, vector<8x128xf32> -> vector<8x128xf32>
    %c0_53 = arith.constant 0 : index
    %c0_54 = arith.constant 0 : index
    %89 = vector.load %arg6[%c0_53, %c0_54] : memref<1x128xf32, #tpu.memory_space<vmem>>, vector<1x128xf32>
    %90 = vector.broadcast %89 : vector<1x128xf32> to vector<8x128xf32>
    %91 = arith.addf %88, %90 : vector<8x128xf32>
    %c0_55 = arith.constant 0 : index
    %c0_56 = arith.constant 0 : index
    %c0_57 = arith.constant 0 : index
    %92 = vector.load %arg7[%c0_55, %c0_56, %c0_57] : memref<1x8x128xf32, #tpu.memory_space<vmem>>, vector<1x8x128xf32>
    %93 = vector.shape_cast %92 : vector<1x8x128xf32> to vector<8x128xf32>
    %94 = vector.shape_cast %91 : vector<8x128xf32> to vector<1x8x128xf32>
    tpu.vector_store %arg7[%c0_55, %c0_56, %c0_57], %94 {strides = array<i32>} : memref<1x8x128xf32, #tpu.memory_space<vmem>>, vector<1x8x128xf32>,
    return
  }
  func.func @transform_0(%arg0: i32, %arg1: i32, %arg2: i32, %arg3: memref<2xi32, #tpu.memory_space<smem>>) -> (i32, i32, i32) {
    %c1_i32 = arith.constant 1 : i32
    %0 = arith.minsi %arg2, %c1_i32 : i32
    %c0_i32 = arith.constant 0 : i32
    %c0_i32_0 = arith.constant 0 : i32
    return %arg1, %0, %c0_i32 : i32, i32, i32
  }
  func.func @transform_1(%arg0: i32, %arg1: i32, %arg2: i32, %arg3: memref<2xi32, #tpu.memory_space<smem>>) -> (i32, i32) {
    %c0_i32 = arith.constant 0 : i32
    %c0_i32_0 = arith.constant 0 : i32
    return %c0_i32, %arg0 : i32, i32
  }
  func.func @transform_2(%arg0: i32, %arg1: i32, %arg2: i32, %arg3: memref<2xi32, #tpu.memory_space<smem>>) -> (i32, i32) {
    %c0_i32 = arith.constant 0 : i32
    %c0_i32_0 = arith.constant 0 : i32
    return %c0_i32, %arg0 : i32, i32
  }
  func.func @transform_3(%arg0: i32, %arg1: i32, %arg2: i32, %arg3: memref<2xi32, #tpu.memory_space<smem>>) -> (i32, i32, i32) {
    %c0_i32 = arith.constant 0 : i32
    return %arg1, %arg2, %arg0 : i32, i32, i32
  }
}

module attributes {stable_mosaic.version = 11 : i64} {
  func.func @_time_reduction_kernel(%arg0: i32, %arg1: i32, %arg2: i32, %arg3: memref<2xi32, #tpu.memory_space<smem>>, %arg4: memref<1x16x32xf32, #tpu.memory_space<vmem>>, %arg5: memref<640x128xf32, #tpu.memory_space<vmem>>, %arg6: memref<1x128xf32, #tpu.memory_space<vmem>>, %arg7: memref<1x8x128xf32, #tpu.memory_space<vmem>>, %arg8: memref<8x640xf32, #tpu.memory_space<vmem>>, %arg9: memref<3x32xf32, #tpu.memory_space<vmem>>) attributes {dimension_semantics = [#tpu.dimension_semantics<parallel>, #tpu.dimension_semantics<parallel>, #tpu.dimension_semantics<arbitrary>], iteration_bounds = array<i64: 1, 2, 2>, scalar_prefetch = 1 : i64, scratch_operands = 2 : i64, tpu.core_type = #tpu.core_type<tc>, window_params = [{transform_indices = @transform_0, window_bounds = array<i64: 1, 16, 32>}, {transform_indices = @transform_1, window_bounds = array<i64: 640, 128>}, {transform_indices = @transform_2, window_bounds = array<i64: 1, 128>}, {transform_indices = @transform_3, window_bounds = array<i64: 1, 8, 128>}]} {
    %0 = arith.index_cast %arg1 : i32 to index
    %1 = memref.load %arg3[%0] : memref<2xi32, #tpu.memory_space<smem>>
    %c16_i32 = arith.constant 16 : i32
    %2 = arith.muli %arg2, %c16_i32 : i32
    %c0_i32 = arith.constant 0 : i32
    %3 = arith.cmpi eq, %arg2, %c0_i32 : i32
    %4 = arith.extui %3 : i1 to i32
    %c0_i32_0 = arith.constant 0 : i32
    %5 = arith.cmpi ne, %4, %c0_i32_0 : i32
    scf.if %5 {
      %cst_58 = arith.constant 0.000000e+00 : f32
      %95 = vector.broadcast %cst_58 : f32 to vector<3x32xf32>
      %c0_59 = arith.constant 0 : index
      %c0_60 = arith.constant 0 : index
      %96 = vector.load %arg9[%c0_59, %c0_60] : memref<3x32xf32, #tpu.memory_space<vmem>>, vector<3x32xf32>
      tpu.vector_store %arg9[%c0_59, %c0_60], %95 {strides = array<i32>} : memref<3x32xf32, #tpu.memory_space<vmem>>, vector<3x32xf32>,
      %cst_61 = arith.constant 0.000000e+00 : f32
      %97 = vector.broadcast %cst_61 : f32 to vector<8x96xf32>
      %c0_62 = arith.constant 0 : index
      %c32 = arith.constant 32 : index
      %98 = vector.load %arg8[%c0_62, %c32] : memref<8x640xf32, #tpu.memory_space<vmem>>, vector<8x96xf32>
      tpu.vector_store %arg8[%c0_62, %c32], %97 {strides = array<i32>} : memref<8x640xf32, #tpu.memory_space<vmem>>, vector<8x96xf32>,
      %cst_63 = arith.constant 0.000000e+00 : f32
      %99 = vector.broadcast %cst_63 : f32 to vector<8x96xf32>
      %c0_64 = arith.constant 0 : index
      %c160 = arith.constant 160 : index
      %100 = vector.load %arg8[%c0_64, %c160] : memref<8x640xf32, #tpu.memory_space<vmem>>, vector<8x96xf32>
      tpu.vector_store %arg8[%c0_64, %c160], %99 {strides = array<i32>} : memref<8x640xf32, #tpu.memory_space<vmem>>, vector<8x96xf32>,
      %cst_65 = arith.constant 0.000000e+00 : f32
      %101 = vector.broadcast %cst_65 : f32 to vector<8x96xf32>
      %c0_66 = arith.constant 0 : index
      %c288 = arith.constant 288 : index
      %102 = vector.load %arg8[%c0_66, %c288] : memref<8x640xf32, #tpu.memory_space<vmem>>, vector<8x96xf32>
      tpu.vector_store %arg8[%c0_66, %c288], %101 {strides = array<i32>} : memref<8x640xf32, #tpu.memory_space<vmem>>, vector<8x96xf32>,
      %cst_67 = arith.constant 0.000000e+00 : f32
      %103 = vector.broadcast %cst_67 : f32 to vector<8x96xf32>
      %c0_68 = arith.constant 0 : index
      %c416 = arith.constant 416 : index
      %104 = vector.load %arg8[%c0_68, %c416] : memref<8x640xf32, #tpu.memory_space<vmem>>, vector<8x96xf32>
      tpu.vector_store %arg8[%c0_68, %c416], %103 {strides = array<i32>} : memref<8x640xf32, #tpu.memory_space<vmem>>, vector<8x96xf32>,
      %cst_69 = arith.constant 0.000000e+00 : f32
      %105 = vector.broadcast %cst_69 : f32 to vector<8x96xf32>
      %c0_70 = arith.constant 0 : index
      %c544 = arith.constant 544 : index
      %106 = vector.load %arg8[%c0_70, %c544] : memref<8x640xf32, #tpu.memory_space<vmem>>, vector<8x96xf32>
      tpu.vector_store %arg8[%c0_70, %c544], %105 {strides = array<i32>} : memref<8x640xf32, #tpu.memory_space<vmem>>, vector<8x96xf32>,
    } else {
    }
    %6 = tpu.iota {dimensions = array<i32: 0>} : vector<8x1xi32>
    %c2_i32 = arith.constant 2 : i32
    %7 = vector.broadcast %c2_i32 : i32 to vector<8x1xi32>
    %8 = arith.muli %7, %6 : vector<8x1xi32>
    %9 = vector.broadcast %2 : i32 to vector<8x1xi32>
    %10 = arith.addi %9, %8 : vector<8x1xi32>
    %c0 = arith.constant 0 : index
    %c1 = arith.constant 1 : index
    %c0_1 = arith.constant 0 : index
    %11 = tpu.strided_load %arg4[%c0, %c1, %c0_1] {strides = array<i32: 1, 2, 1>} : memref<1x16x32xf32, #tpu.memory_space<vmem>>, vector<1x6x32xf32>
    %12 = vector.shape_cast %11 : vector<1x6x32xf32> to vector<6x32xf32>
    %13 = vector.extract_strided_slice %10 {offsets = [2, 0], sizes = [6, 1], strides = [1, 1]} : vector<8x1xi32> to vector<6x1xi32>
    %c3_i32 = arith.constant 3 : i32
    %14 = arith.addi %1, %c3_i32 : i32
    %15 = vector.broadcast %14 : i32 to vector<6x1xi32>
    %16 = arith.cmpi slt, %13, %15 : vector<6x1xi32>
    %cst = arith.constant 0.000000e+00 : f32
    %17 = vector.shape_cast %16 : vector<6x1xi1> to vector<6x1xi1>
    %18 = vector.broadcast %17 : vector<6x1xi1> to vector<6x32xi1>
    %19 = vector.broadcast %cst : f32 to vector<6x32xf32>
    %20 = arith.select %18, %12, %19 : vector<6x32xi1>, vector<6x32xf32>
    %c2 = arith.constant 2 : index
    %c0_2 = arith.constant 0 : index
    %21 = vector.load %arg8[%c2, %c0_2] : memref<8x640xf32, #tpu.memory_space<vmem>>, vector<6x32xf32>
    tpu.vector_store %arg8[%c2, %c0_2], %20 {strides = array<i32>} : memref<8x640xf32, #tpu.memory_space<vmem>>, vector<6x32xf32>,
    %c0_3 = arith.constant 0 : index
    %c0_4 = arith.constant 0 : index
    %22 = vector.load %arg9[%c0_3, %c0_4] : memref<3x32xf32, #tpu.memory_space<vmem>>, vector<1x32xf32>
    %c0_5 = arith.constant 0 : index
    %c0_6 = arith.constant 0 : index
    %23 = vector.load %arg8[%c0_5, %c0_6] : memref<8x640xf32, #tpu.memory_space<vmem>>, vector<1x32xf32>
    tpu.vector_store %arg8[%c0_5, %c0_6], %22 {strides = array<i32>} : memref<8x640xf32, #tpu.memory_space<vmem>>, vector<1x32xf32>,
    %c2_7 = arith.constant 2 : index
    %c0_8 = arith.constant 0 : index
    %24 = vector.load %arg9[%c2_7, %c0_8] : memref<3x32xf32, #tpu.memory_space<vmem>>, vector<1x32xf32>
    %c1_9 = arith.constant 1 : index
    %c0_10 = arith.constant 0 : index
    %25 = vector.load %arg8[%c1_9, %c0_10] : memref<8x640xf32, #tpu.memory_space<vmem>>, vector<1x32xf32>
    tpu.vector_store %arg8[%c1_9, %c0_10], %24 {strides = array<i32>} : memref<8x640xf32, #tpu.memory_space<vmem>>, vector<1x32xf32>,
    %c0_11 = arith.constant 0 : index
    %c0_12 = arith.constant 0 : index
    %c0_13 = arith.constant 0 : index
    %26 = tpu.strided_load %arg4[%c0_11, %c0_12, %c0_13] {strides = array<i32: 1, 2, 1>} : memref<1x16x32xf32, #tpu.memory_space<vmem>>, vector<1x7x32xf32>
    %27 = vector.shape_cast %26 : vector<1x7x32xf32> to vector<7x32xf32>
    %28 = vector.extract_strided_slice %10 {offsets = [1, 0], sizes = [7, 1], strides = [1, 1]} : vector<8x1xi32> to vector<7x1xi32>
    %c2_i32_14 = arith.constant 2 : i32
    %29 = arith.addi %1, %c2_i32_14 : i32
    %30 = vector.broadcast %29 : i32 to vector<7x1xi32>
    %31 = arith.cmpi slt, %28, %30 : vector<7x1xi32>
    %cst_15 = arith.constant 0.000000e+00 : f32
    %32 = vector.shape_cast %31 : vector<7x1xi1> to vector<7x1xi1>
    %33 = vector.broadcast %32 : vector<7x1xi1> to vector<7x32xi1>
    %34 = vector.broadcast %cst_15 : f32 to vector<7x32xf32>
    %35 = arith.select %33, %27, %34 : vector<7x32xi1>, vector<7x32xf32>
    %c1_16 = arith.constant 1 : index
    %c128 = arith.constant 128 : index
    %36 = vector.load %arg8[%c1_16, %c128] : memref<8x640xf32, #tpu.memory_space<vmem>>, vector<7x32xf32>
    tpu.vector_store %arg8[%c1_16, %c128], %35 {strides = array<i32>} : memref<8x640xf32, #tpu.memory_space<vmem>>, vector<7x32xf32>,
    %c1_17 = arith.constant 1 : index
    %c0_18 = arith.constant 0 : index
    %37 = vector.load %arg9[%c1_17, %c0_18] : memref<3x32xf32, #tpu.memory_space<vmem>>, vector<1x32xf32>
    %c0_19 = arith.constant 0 : index
    %c128_20 = arith.constant 128 : index
    %38 = vector.load %arg8[%c0_19, %c128_20] : memref<8x640xf32, #tpu.memory_space<vmem>>, vector<1x32xf32>
    tpu.vector_store %arg8[%c0_19, %c128_20], %37 {strides = array<i32>} : memref<8x640xf32, #tpu.memory_space<vmem>>, vector<1x32xf32>,
    %c0_21 = arith.constant 0 : index
    %c1_22 = arith.constant 1 : index
    %c0_23 = arith.constant 0 : index
    %39 = tpu.strided_load %arg4[%c0_21, %c1_22, %c0_23] {strides = array<i32: 1, 2, 1>} : memref<1x16x32xf32, #tpu.memory_space<vmem>>, vector<1x7x32xf32>
    %40 = vector.shape_cast %39 : vector<1x7x32xf32> to vector<7x32xf32>
    %41 = vector.extract_strided_slice %10 {offsets = [1, 0], sizes = [7, 1], strides = [1, 1]} : vector<8x1xi32> to vector<7x1xi32>
    %c1_i32 = arith.constant 1 : i32
    %42 = arith.addi %1, %c1_i32 : i32
    %43 = vector.broadcast %42 : i32 to vector<7x1xi32>
    %44 = arith.cmpi slt, %41, %43 : vector<7x1xi32>
    %cst_24 = arith.constant 0.000000e+00 : f32
    %45 = vector.shape_cast %44 : vector<7x1xi1> to vector<7x1xi1>
    %46 = vector.broadcast %45 : vector<7x1xi1> to vector<7x32xi1>
    %47 = vector.broadcast %cst_24 : f32 to vector<7x32xf32>
    %48 = arith.select %46, %40, %47 : vector<7x32xi1>, vector<7x32xf32>
    %c1_25 = arith.constant 1 : index
    %c256 = arith.constant 256 : index
    %49 = vector.load %arg8[%c1_25, %c256] : memref<8x640xf32, #tpu.memory_space<vmem>>, vector<7x32xf32>
    tpu.vector_store %arg8[%c1_25, %c256], %48 {strides = array<i32>} : memref<8x640xf32, #tpu.memory_space<vmem>>, vector<7x32xf32>,
    %c2_26 = arith.constant 2 : index
    %c0_27 = arith.constant 0 : index
    %50 = vector.load %arg9[%c2_26, %c0_27] : memref<3x32xf32, #tpu.memory_space<vmem>>, vector<1x32xf32>
    %c0_28 = arith.constant 0 : index
    %c256_29 = arith.constant 256 : index
    %51 = vector.load %arg8[%c0_28, %c256_29] : memref<8x640xf32, #tpu.memory_space<vmem>>, vector<1x32xf32>
    tpu.vector_store %arg8[%c0_28, %c256_29], %50 {strides = array<i32>} : memref<8x640xf32, #tpu.memory_space<vmem>>, vector<1x32xf32>,
    %c0_30 = arith.constant 0 : index
    %c0_31 = arith.constant 0 : index
    %c0_32 = arith.constant 0 : index
    %52 = tpu.strided_load %arg4[%c0_30, %c0_31, %c0_32] {strides = array<i32: 1, 2, 1>} : memref<1x16x32xf32, #tpu.memory_space<vmem>>, vector<1x8x32xf32>
    %53 = vector.shape_cast %52 : vector<1x8x32xf32> to vector<8x32xf32>
    %c0_i32_33 = arith.constant 0 : i32
    %54 = arith.addi %1, %c0_i32_33 : i32
    %55 = vector.broadcast %54 : i32 to vector<8x1xi32>
    %56 = arith.cmpi slt, %10, %55 : vector<8x1xi32>
    %cst_34 = arith.constant 0.000000e+00 : f32
    %57 = vector.shape_cast %56 : vector<8x1xi1> to vector<8x1xi1>
    %58 = vector.broadcast %57 : vector<8x1xi1> to vector<8x32xi1>
    %59 = vector.broadcast %cst_34 : f32 to vector<8x32xf32>
    %60 = arith.select %58, %53, %59 : vector<8x32xi1>, vector<8x32xf32>
    %c0_35 = arith.constant 0 : index
    %c384 = arith.constant 384 : index
    %61 = vector.load %arg8[%c0_35, %c384] : memref<8x640xf32, #tpu.memory_space<vmem>>, vector<8x32xf32>
    tpu.vector_store %arg8[%c0_35, %c384], %60 {strides = array<i32>} : memref<8x640xf32, #tpu.memory_space<vmem>>, vector<8x32xf32>,
    %c0_36 = arith.constant 0 : index
    %c1_37 = arith.constant 1 : index
    %c0_38 = arith.constant 0 : index
    %62 = tpu.strided_load %arg4[%c0_36, %c1_37, %c0_38] {strides = array<i32: 1, 2, 1>} : memref<1x16x32xf32, #tpu.memory_space<vmem>>, vector<1x8x32xf32>
    %63 = vector.shape_cast %62 : vector<1x8x32xf32> to vector<8x32xf32>
    %c-1_i32 = arith.constant -1 : i32
    %64 = arith.addi %1, %c-1_i32 : i32
    %65 = vector.broadcast %64 : i32 to vector<8x1xi32>
    %66 = arith.cmpi slt, %10, %65 : vector<8x1xi32>
    %cst_39 = arith.constant 0.000000e+00 : f32
    %67 = vector.shape_cast %66 : vector<8x1xi1> to vector<8x1xi1>
    %68 = vector.broadcast %67 : vector<8x1xi1> to vector<8x32xi1>
    %69 = vector.broadcast %cst_39 : f32 to vector<8x32xf32>
    %70 = arith.select %68, %63, %69 : vector<8x32xi1>, vector<8x32xf32>
    %c0_40 = arith.constant 0 : index
    %c512 = arith.constant 512 : index
    %71 = vector.load %arg8[%c0_40, %c512] : memref<8x640xf32, #tpu.memory_space<vmem>>, vector<8x32xf32>
    tpu.vector_store %arg8[%c0_40, %c512], %70 {strides = array<i32>} : memref<8x640xf32, #tpu.memory_space<vmem>>, vector<8x32xf32>,
    %c16_i32_41 = arith.constant 16 : i32
    %72 = arith.addi %2, %c16_i32_41 : i32
    %c3_i32_42 = arith.constant 3 : i32
    %73 = arith.subi %72, %c3_i32_42 : i32
    %74 = tpu.iota {dimensions = array<i32: 0>} : vector<3x1xi32>
    %75 = vector.broadcast %73 : i32 to vector<3x1xi32>
    %76 = arith.addi %75, %74 : vector<3x1xi32>
    %c0_43 = arith.constant 0 : index
    %c13 = arith.constant 13 : index
    %c0_44 = arith.constant 0 : index
    %77 = vector.load %arg4[%c0_43, %c13, %c0_44] : memref<1x16x32xf32, #tpu.memory_space<vmem>>, vector<1x3x32xf32>
    %78 = vector.shape_cast %77 : vector<1x3x32xf32> to vector<3x32xf32>
    %79 = vector.broadcast %1 : i32 to vector<3x1xi32>
    %80 = arith.cmpi slt, %76, %79 : vector<3x1xi32>
    %cst_45 = arith.constant 0.000000e+00 : f32
    %81 = vector.shape_cast %80 : vector<3x1xi1> to vector<3x1xi1>
    %82 = vector.broadcast %81 : vector<3x1xi1> to vector<3x32xi1>
    %83 = vector.broadcast %cst_45 : f32 to vector<3x32xf32>
    %84 = arith.select %82, %78, %83 : vector<3x32xi1>, vector<3x32xf32>
    %c0_46 = arith.constant 0 : index
    %c0_47 = arith.constant 0 : index
    %85 = vector.load %arg9[%c0_46, %c0_47] : memref<3x32xf32, #tpu.memory_space<vmem>>, vector<3x32xf32>
    tpu.vector_store %arg9[%c0_46, %c0_47], %84 {strides = array<i32>} : memref<3x32xf32, #tpu.memory_space<vmem>>, vector<3x32xf32>,
    %c0_48 = arith.constant 0 : index
    %c0_49 = arith.constant 0 : index
    %86 = vector.load %arg8[%c0_48, %c0_49] : memref<8x640xf32, #tpu.memory_space<vmem>>, vector<8x640xf32>
    %c0_50 = arith.constant 0 : index
    %c0_51 = arith.constant 0 : index
    %87 = vector.load %arg5[%c0_50, %c0_51] : memref<640x128xf32, #tpu.memory_space<vmem>>, vector<640x128xf32>
    %cst_52 = arith.constant dense<0.000000e+00> : vector<8x128xf32>
    %88 = tpu.matmul %86, %87, %cst_52 {dimension_numbers = #tpu.dot_dimension_numbers<[1], [0], [0], [1], [0, 0, 1, 1], [], []>} : vector<8x640xf32>, vector<640x128xf32>, vector<8x128xf32> -> vector<8x128xf32>
    %c0_53 = arith.constant 0 : index
    %c0_54 = arith.constant 0 : index
    %89 = vector.load %arg6[%c0_53, %c0_54] : memref<1x128xf32, #tpu.memory_space<vmem>>, vector<1x128xf32>
    %90 = vector.broadcast %89 : vector<1x128xf32> to vector<8x128xf32>
    %91 = arith.addf %88, %90 : vector<8x128xf32>
    %c0_55 = arith.constant 0 : index
    %c0_56 = arith.constant 0 : index
    %c0_57 = arith.constant 0 : index
    %92 = vector.load %arg7[%c0_55, %c0_56, %c0_57] : memref<1x8x128xf32, #tpu.memory_space<vmem>>, vector<1x8x128xf32>
    %93 = vector.shape_cast %92 : vector<1x8x128xf32> to vector<8x128xf32>
    %94 = vector.shape_cast %91 : vector<8x128xf32> to vector<1x8x128xf32>
    tpu.vector_store %arg7[%c0_55, %c0_56, %c0_57], %94 {strides = array<i32>} : memref<1x8x128xf32, #tpu.memory_space<vmem>>, vector<1x8x128xf32>,
    return
  }
  func.func @transform_0(%arg0: i32, %arg1: i32, %arg2: i32, %arg3: memref<2xi32, #tpu.memory_space<smem>>) -> (i32, i32, i32) {
    %c1_i32 = arith.constant 1 : i32
    %0 = arith.minsi %arg2, %c1_i32 : i32
    %c0_i32 = arith.constant 0 : i32
    %c0_i32_0 = arith.constant 0 : i32
    return %arg1, %0, %c0_i32 : i32, i32, i32
  }
  func.func @transform_1(%arg0: i32, %arg1: i32, %arg2: i32, %arg3: memref<2xi32, #tpu.memory_space<smem>>) -> (i32, i32) {
    %c0_i32 = arith.constant 0 : i32
    %c0_i32_0 = arith.constant 0 : i32
    return %c0_i32, %arg0 : i32, i32
  }
  func.func @transform_2(%arg0: i32, %arg1: i32, %arg2: i32, %arg3: memref<2xi32, #tpu.memory_space<smem>>) -> (i32, i32) {
    %c0_i32 = arith.constant 0 : i32
    %c0_i32_0 = arith.constant 0 : i32
    return %c0_i32, %arg0 : i32, i32
  }
  func.func @transform_3(%arg0: i32, %arg1: i32, %arg2: i32, %arg3: memref<2xi32, #tpu.memory_space<smem>>) -> (i32, i32, i32) {
    %c0_i32 = arith.constant 0 : i32
    return %arg1, %arg2, %arg0 : i32, i32, i32
  }
}

</mosaic_0001>

<bundles_post_ra>
// kernel: tpu_custom_call.1
= control target key start
LH: loop header
LB: loop body
LE: loop exit
PB: predicated region body
PF: predicated region fallthrough
CT: control target
= control target key end

     0   :  { %s1294_s0 = inlined_call_operand.vmem [shape: s32[2], index: 0, kind: input, shape index: {}]   ;;  %s1295_s1 = inlined_call_operand.vmem [shape: f32[2,20,32], index: 1, kind: input, shape index: {}]   ;;  %s1296_s2 = inlined_call_operand.hbm [shape: f32[640,128], index: 2, kind: input, shape index: {}]   ;;  %s1297_s3 = inlined_call_operand.vmem [shape: f32[1,128], index: 3, kind: input, shape index: {}]   ;;  %s1298_s4 = inlined_call_operand.vmem [shape: f32[2,11,128], index: 4, kind: output, shape index: {}]  }
   0x1   :  { %s9_s17 = sshll.u32 %s1294_s0, 4  ;;  %s10_s17 = int_to_ptr.vmem [resolvable:$true] %s9_s17 }
   0x2   :  { %s1018_s18 = scalar_lea.vmem %s10_s17, 16  ;;  %p1023_p1 = scmp.lt.s32.totalorder %s10_s17, %s10_s17 }
   0x3   :  { %p1019_p0 = scmp.ne.s32.totalorder %s10_s17, %s1018_s18  ;;  %p1024_p2 = scmp.lt.s32.totalorder %s1018_s18, %s1018_s18 }
   0x5   :  { %p1025_p3 = por %p1024_p2, %p1023_p1 }
   0x7   :  { %p1026_p4 = pnand %p1025_p3, %p1019_p0 }
   0x9   :  { %1029 = shalt.err (!%p1026_p4)  }
   0xa   :  { %s1102_s19 = smov [#allocation5]  }
   0xb   :  { %12 = dma.vmem_to_smem %s10_s17, 16, %s1102_s19, [#allocation4] }
   0xc   :  { %1076 = dma.done.wait [#allocation4], 16 }
   0xd   :  { %1077 = vsyncadd [#allocation4], 4294967280 }
   0xe   :  { %14 = sfence }
   0xf   :  { %15 = vsyncpa [#allocation7], 0  ;;  %s1137_s20 = smov 0   ;;  %s1139_s21 = smov 0  }
  0x10   :  { %s1141_s22 = smov 0   ;;  %s1143_s0 = smov 0  }
  0x11   :  { %s1145_s23 = smov 0  }
  0x12 LB: > { %s818_s24 = sadd.s32 4294967295, %s1100_s23   ;;  %s33_s25 = sadd.s32 1, %s1092_s22  ;;  %s1100_s23 = sphi %s1145_s23, %s21_s23   ;;  %s1096_s0 = sphi %s1143_s0, %s1309_s0   ;;  %s1092_s22 = sphi %s1141_s22, %s1308_s22   ;;  %s1088_s21 = sphi %s1139_s21, %s1307_s21   ;;  %s1084_s20 = sphi %s1137_s20, %s1306_s20  }
  0x13   : > { %p34_p5 = scmp.ge.s32.totalorder %s33_s25, 2  ;;  %s36_s26 = sadd.s32 1, %s1096_s0 }
  0x14   : > { %p820_p6 = scmp.ge.s32.totalorder %s1100_s23, 1  ;;  %p159_p7 = scmp.lt.s32.totalorder %s1100_s23, 5 }
  0x15   : > { %s1311_s25 = smov (%p34_p5, %s33_s25), 0  ;;  %s1313_s26 = smov (!%p34_p5, %s36_s26), %s1096_s0 }
  0x16   : > { %p1170_p8 = pnand %p820_p6, %p159_p7  ;;  %p38_p9 = scmp.ge.s32.totalorder %s1313_s26, 2 }
  0x17   : > { %p1174_p10 = scmp.eq.s32.totalorder %s818_s24, 0  ;;  %s1103_s29 = smov [#allocation6]  }
  0x18   : > { %p965_p11 = pneg %p1170_p8  ;;  %s1315_s26 = smov (%p38_p9, %s1313_s26), 0 }
  0x19   : > { %s173_s30 = sshll.u32 %s1103_s29, 4  ;;  %s174_s30 = int_to_ptr.vmem [resolvable:$true] %s173_s30 }
  0x1a   : > { %p1184_p12 = pnand %p1174_p10, %p965_p11  ;;  %s1041_s6 = scalar_lea.vmem %s174_s30, 10240 }
  0x1b   : > { %p1042_p0 = scmp.ne.s32.totalorder %s174_s30, %s1041_s6  ;;  %p1049_p3 = scmp.lt.s32.totalorder %s174_s30, %s174_s30 }
  0x1c   : > { %p1032_p13 = pneg %p1184_p12  ;;  %p1050_p4 = scmp.lt.s32.totalorder %s1041_s6, %s1041_s6 }
  0x1e   : > { %p1044_p1 = pnand %p1042_p0, %p1032_p13  ;;  %p1051_p5 = por %p1050_p4, %p1049_p3 }
  0x20   : > { %p1045_p2 = pneg %p1044_p1 }
  0x22   : > { %p1052_p6 = pnand %p1051_p5, %p1045_p2 }
  0x24   : > { %1055 = shalt.err (!%p1052_p6)
}
  0x25   : > { %s1104_s7 = smov 128   ;;  %s1105_s8 = smov 8  }
  0x26   : > { %968 = dma.hbm_to_vmem [thread:$0]  (!%p1184_p12), %s1296_s2, 10240, %s174_s30, [#allocation7], %s1104_s7, %s1104_s7, %s1105_s8  }
  0x27   : > { %220 = sbr.rel (%p1170_p8) target bundleno = 324 (0x144), region = 32 }
  0x2c   : > { %1079 = dma.done.wait (%p1174_p10), [#allocation7], 10240  }
  0x2d   : > { %1081 = vsyncadd (%p1174_p10), [#allocation7], 4294957056  ;;  %p263_p7 = scmp.lt.s32.totalorder %s1084_s20, 1  ;;  %p270_p9 = scmp.lt.s32.totalorder %s1088_s21, 1 }
  0x2e   : > { %s1204_s11 = sld [smem:[#allocation5 + %s1088_s21]]  ;;  %s830_s12 = sshll.u32 %s1084_s20, 4 }
  0x2f   : > { %s264_s13 = scalar_select %p263_p7, %s1084_s20, 1 }
  0x30   : > { %s1317_s21 = smov (!%p270_p9, %s1088_s21), 1  ;;  %p831_p10 = scmp.ne.s32.totalorder %s1084_s20, 0 }
  0x31   : > { %s826_s14 = sshll.u32 %s264_s13, 1  ;;  %s960_s15 = smul.u32 3, %s1317_s21 }
  0x32   : > { %p272_p8 = scmp.lt.s32.totalorder %s826_s14, 2  ;;  %s828_s16 = sshll.u32 %s1317_s21, 1 }
  0x33   : > { %s296_s17 = sadd.s32 %s828_s16, %s264_s13  ;;  %304 = sbr.rel (%p831_p10) target bundleno = 61 (0x3d), region = 40 }
  0x34   : > { %s1319_s14 = smov (!%p272_p8, %s826_s14), 2  ;;  %s829_s19 = sshll.u32 %s296_s17, 3 }
  0x35   : > { %s275_s18 = sadd.s32 %s960_s15, %s1319_s14  ;;  %s1212_s29 = scalar_lea.vmem %s1298_s4, %s829_s19 }
  0x36   : > { %s827_s24 = sshll.u32 %s275_s18, 3 }
  0x37   : > { %s1217_s6 = scalar_lea.vmem %s1295_s1, %s827_s24 }
  0x38   : > { %vm305_vm0 = vcmask 256000   ;;  %vm307_vm1 = vcmask 1047808   ;;  %v1106_v0 = vmov 0.0  }
  0x39   : > { %306 = vst.msk [vmem:[#allocation3] sm:$0x7] %vm305_vm0, %v1106_v0 }
  0x3a   : > { %308 = vst.msk [vmem:[#allocation2] sm:$0xff] %vm307_vm1, %v1106_v0  ;;  %309 = vst.msk [vmem:[#allocation2 + $0x8] sm:$0xff] %vm307_vm1, %v1106_v0 }
  0x3b   : > { %310 = vst.msk [vmem:[#allocation2 + $0x10] sm:$0xff] %vm307_vm1, %v1106_v0  ;;  %311 = vst.msk [vmem:[#allocation2 + $0x18] sm:$0xff] %vm307_vm1, %v1106_v0 }
  0x3c   : > { %312 = vst.msk [vmem:[#allocation2 + $0x20] sm:$0xff] %vm307_vm1, %v1106_v0 }
  0x3d PF: > { %v425_v1 = vld [vmem:[#allocation6 + $0xf8] sm:$0xff]  ;;  %v424_v3 = vld [vmem:[#allocation6 + $0xf0] sm:$0xff]  ;;  %v423_v7 = vld [vmem:[#allocation6 + $0xe8] sm:$0xff]  ;;  %v313_v14 = vlaneseq  ;;  %s1222_s21 = sadd.s32 13, %s830_s12  ;;  %v316_v35 = vstv %s830_s12  ;;  %s337_s7 = sadd.s32 2, %s1204_s11  ;;  %vm332_vm2 = vcmask 253952   ;;  %v364_v52 = vstv %s1204_s11 }
  0x3e   : > { %v409_v2 = vld [vmem:[#allocation6 + $0x78] sm:$0xff]  ;;  %838 = vmatprep.subr.mxu0 %v425_v1  ;;  %v408_v5 = vld [vmem:[#allocation6 + $0x70] sm:$0xff]  ;;  %v407_v9 = vld [vmem:[#allocation6 + $0x68] sm:$0xff]  ;;  %s320_s8 = sadd.s32 3, %s1204_s11  ;;  %s372_s9 = sadd.s32 4294967295, %s1204_s11  ;;  %v380_v40 = vstv %s1222_s21  ;;  %v338_v47 = vstv %s337_s7  ;;  %vm346_vm3 = vcmask 261121  }
  0x3f   : > { %v457_v4 = vld [vmem:[#allocation6 + $0x1f8] sm:$0xff]  ;;  %839 = vmatpush3.msra.mxu0 %v409_v2  ;;  %v456_v8 = vld [vmem:[#allocation6 + $0x1f0] sm:$0xff]  ;;  %v455_v11 = vld [vmem:[#allocation6 + $0x1e8] sm:$0xff]  ;;  %v314_v23 = vshrl.u32 %v313_v14, 7  ;;  %vm329_vm4 = vcmask 261122   ;;  %v321_v51 = vstv %s320_s8  ;;  %v373_v53 = vstv %s372_s9  ;;  %s351_s20 = sadd.s32 1, %s1204_s11 }
  0x40   : > { %v441_v6 = vld [vmem:[#allocation6 + $0x178] sm:$0xff]  ;;  %873 = vmatprep.subr.mxu1 %v457_v4  ;;  %840 = vmatprep.subr.mxu0 %v424_v3  ;;  %v440_v10 = vld [vmem:[#allocation6 + $0x170] sm:$0xff]  ;;  %v422_v12 = vld [vmem:[#allocation6 + $0xe0] sm:$0xff]  ;;  %vm369_vm5 = vcmask 261120   ;;  %vm387_vm6 = vcmask 256000   ;;  %vm1108_vm13 = vmmov 0  }
  0x41   : > { %874 = vmatpush3.msra.mxu1 %v441_v6  ;;  %841 = vmatpush3.msra.mxu0 %v408_v5  ;;  %v439_v13 = vld [vmem:[#allocation6 + $0x168] sm:$0xff]  ;;  %v406_v15 = vld [vmem:[#allocation6 + $0x60] sm:$0xff]  ;;  %v421_v17 = vld [vmem:[#allocation6 + $0xd8] sm:$0xff]  ;;  %v315_v32 = vmul.u32 2, %v314_v23  ;;  %v381_v54 = vadd.s32 %v380_v40, %v314_v23 }
  0x42   : > { %875 = vmatprep.subr.mxu1 %v456_v8  ;;  %842 = vmatprep.subr.mxu0 %v423_v7  ;;  %v454_v16 = vld [vmem:[#allocation6 + $0x1e0] sm:$0xff]  ;;  %v405_v19 = vld [vmem:[#allocation6 + $0x58] sm:$0xff]  ;;  %v420_v21 = vld [vmem:[#allocation6 + $0xd0] sm:$0xff] }
  0x43   : > { %876 = vmatpush3.msra.mxu1 %v440_v10  ;;  %843 = vmatpush3.msra.mxu0 %v407_v9  ;;  %v438_v18 = vld [vmem:[#allocation6 + $0x160] sm:$0xff]  ;;  %v453_v20 = vld [vmem:[#allocation6 + $0x1d8] sm:$0xff]  ;;  %v404_v24 = vld [vmem:[#allocation6 + $0x50] sm:$0xff]  ;;  %v1230_v43 = vadd.s32 %v316_v35, %v315_v32  ;;  %vm1245_vm11 = vcmp.lt.s32.totalorder %v381_v54, %v364_v52  ;;  %v352_v9 = vstv %s351_s20 }
  0x44   : > { %877 = vmatprep.subr.mxu1 %v455_v11  ;;  %844 = vmatprep.subr.mxu0 %v422_v12  ;;  %v437_v22 = vld [vmem:[#allocation6 + $0x158] sm:$0xff]  ;;  %v452_v25 = vld [vmem:[#allocation6 + $0x1d0] sm:$0xff]  ;;  %v419_v26 = vld [vmem:[#allocation6 + $0xc8] sm:$0xff] }
  0x45   : > { %878 = vmatpush3.msra.mxu1 %v439_v13  ;;  %845 = vmatpush3.msra.mxu0 %v406_v15  ;;  %v436_v27 = vld [vmem:[#allocation6 + $0x150] sm:$0xff]  ;;  %v403_v28 = vld [vmem:[#allocation6 + $0x48] sm:$0xff]  ;;  %v418_v30 = vld [vmem:[#allocation6 + $0xc0] sm:$0xff]  ;;  %vm339_vm7 = vcmp.lt.s32.totalorder %v1230_v43, %v338_v47  ;;  %vm322_vm8 = vcmp.lt.s32.totalorder %v1230_v43, %v321_v51  ;;  %vm1240_vm9 = vcmp.lt.s32.totalorder %v1230_v43, %v364_v52 }
  0x46   : > { %879 = vmatprep.subr.mxu1 %v454_v16  ;;  %846 = vmatprep.subr.mxu0 %v421_v17  ;;  %v451_v29 = vld [vmem:[#allocation6 + $0x1c8] sm:$0xff]  ;;  %v402_v33 = vld [vmem:[#allocation6 + $0x40] sm:$0xff]  ;;  %v417_v36 = vld [vmem:[#allocation6 + $0xb8] sm:$0xff]  ;;  %vm374_vm10 = vcmp.lt.s32.totalorder %v1230_v43, %v373_v53  ;;  %vm353_vm12 = vcmp.lt.s32.totalorder %v1230_v43, %v352_v9 }
  0x47   : > { %880 = vmatpush3.msra.mxu1 %v438_v18  ;;  %847 = vmatpush3.msra.mxu0 %v405_v19  ;;  %v435_v31 = vld [vmem:[#allocation6 + $0x148] sm:$0xff]  ;;  %v450_v34 = vld [vmem:[#allocation6 + $0x1c0] sm:$0xff]  ;;  %v401_v38 = vld [vmem:[#allocation6 + $0x38] sm:$0xff] }
  0x48   : > { %881 = vmatprep.subr.mxu1 %v453_v20  ;;  %848 = vmatprep.subr.mxu0 %v420_v21  ;;  %v434_v37 = vld [vmem:[#allocation6 + $0x140] sm:$0xff]  ;;  %v449_v39 = vld [vmem:[#allocation6 + $0x1b8] sm:$0xff]  ;;  %v416_v41 = vld [vmem:[#allocation6 + $0xb0] sm:$0xff] }
  0x49   : > { %882 = vmatpush3.msra.mxu1 %v437_v22  ;;  %849 = vmatpush3.msra.mxu0 %v404_v24  ;;  %v433_v42 = vld [vmem:[#allocation6 + $0x138] sm:$0xff]  ;;  %v400_v44 = vld [vmem:[#allocation6 + $0x30] sm:$0xff]  ;;  %v415_v45 = vld [vmem:[#allocation6 + $0xa8] sm:$0xff] }
  0x4a   : > { %883 = vmatprep.subr.mxu1 %v452_v25  ;;  %850 = vmatprep.subr.mxu0 %v419_v26  ;;  %v448_v46 = vld [vmem:[#allocation6 + $0x1b0] sm:$0xff]  ;;  %v399_v48 = vld [vmem:[#allocation6 + $0x28] sm:$0xff]  ;;  %v414_v50 = vld [vmem:[#allocation6 + $0xa0] sm:$0xff] }
  0x4b   : > { %884 = vmatpush3.msra.mxu1 %v436_v27  ;;  %851 = vmatpush3.msra.mxu0 %v403_v28  ;;  %v432_v49 = vld [vmem:[#allocation6 + $0x130] sm:$0xff]  ;;  %v447_v55 = vld [vmem:[#allocation6 + $0x1a8] sm:$0xff]  ;;  %v398_v56 = vld [vmem:[#allocation6 + $0x20] sm:$0xff] }
  0x4c   : > { %885 = vmatprep.subr.mxu1 %v451_v29  ;;  %852 = vmatprep.subr.mxu0 %v418_v30  ;;  %v431_v57 = vld [vmem:[#allocation6 + $0x128] sm:$0xff]  ;;  %v413_v58 = vld [vmem:[#allocation6 + $0x98] sm:$0xff]  ;;  %v446_v59 = vld [vmem:[#allocation6 + $0x1a0] sm:$0xff] }
  0x4d   : > { %886 = vmatpush3.msra.mxu1 %v435_v31  ;;  %853 = vmatpush3.msra.mxu0 %v402_v33  ;;  %v336_v60 = vld [vmem:[%s1217_s6] ss:$2 sm:$0x7f]  ;;  %v348_v61 = vld [vmem:[#allocation3 + $0x1] sm:$0x1]  ;;  %v411_v23 = vld [vmem:[#allocation6 + $0x88] sm:$0xff] }
  0x4e   : > { %887 = vmatprep.subr.mxu1 %v450_v34  ;;  %854 = vmatprep.subr.mxu0 %v417_v36  ;;  %v397_v62 = vld [vmem:[#allocation6 + $0x18] sm:$0xff]  ;;  %v430_v63 = vld [vmem:[#allocation6 + $0x120] sm:$0xff]  ;;  %v343_v0 = vrot.slane %v336_v60, 7  ;;  %349 = vst.msk [vmem:[#allocation2 + $0x8] sm:$0x1] %vm332_vm2, %v348_v61  ;;  %v412_v3 = vld [vmem:[#allocation6 + $0x90] sm:$0xff] }
  0x4f   : > { %888 = vmatpush3.msra.mxu1 %v434_v37  ;;  %855 = vmatpush3.msra.mxu0 %v401_v38  ;;  %v832_v1 = vld [vmem:[%s1217_s6 + $0x1] ss:$2 sm:$0x3f]  ;;  %v331_v6 = vld [vmem:[#allocation3] sm:$0x1]  ;;  %v395_v26 = vld [vmem:[#allocation6 + $0x8] sm:$0xff] }
  0x50   : > { %889 = vmatprep.subr.mxu1 %v449_v39  ;;  %856 = vmatprep.subr.mxu0 %v416_v41  ;;  %v445_v4 = vld [vmem:[#allocation6 + $0x198] sm:$0xff]  ;;  %v326_v5 = vrot.slane %v832_v1, 6  ;;  %v396_v10 = vld [vmem:[#allocation6 + $0x10] sm:$0xff]  ;;  %v345_v12 = vsel %vm339_vm7, %v343_v0, 0.0  ;;  %333 = vst.msk [vmem:[#allocation2] sm:$0x1] %vm332_vm2, %v331_v6 }
  0x51   : > { %890 = vmatpush3.msra.mxu1 %v433_v42  ;;  %857 = vmatpush3.msra.mxu0 %v400_v44  ;;  %v334_v7 = vld [vmem:[#allocation3 + $0x2] sm:$0x1]  ;;  %v834_v14 = vld [vmem:[%s1217_s6 + $0x1] ss:$2 sm:$0xff]  ;;  %347 = vst.msk [vmem:[#allocation2 + $0x8] sm:$0xfe] %vm346_vm3, %v345_v12 }
  0x52   : > { %891 = vmatprep.subr.mxu1 %v448_v46  ;;  %858 = vmatprep.subr.mxu0 %v415_v45  ;;  %v429_v11 = vld [vmem:[#allocation6 + $0x118] sm:$0xff]  ;;  %335 = vst.msk [vmem:[#allocation2 + $0x1] sm:$0x1] %vm332_vm2, %v334_v7  ;;  %v444_v15 = vld [vmem:[#allocation6 + $0x190] sm:$0xff]  ;;  %v328_v16 = vsel %vm322_vm8, %v326_v5, 0.0  ;;  %v377_v18 = vsel %vm374_vm10, %v834_v14, 0.0 }
  0x53   : > { %892 = vmatpush3.msra.mxu1 %v432_v49  ;;  %859 = vmatpush3.msra.mxu0 %v399_v48  ;;  %v363_v13 = vld [vmem:[%s1217_s6] ss:$2 sm:$0xff]  ;;  %330 = vst.msk [vmem:[#allocation2] sm:$0xfc] %vm329_vm4, %v328_v16  ;;  %v443_v27 = vld [vmem:[#allocation6 + $0x188] sm:$0xff]  ;;  %v1107_v38 = vmov 0.0  }
  0x54   : > { %893 = vmatprep.subr.mxu1 %v447_v55  ;;  %860 = vmatprep.subr.mxu0 %v414_v50  ;;  %v368_v17 = vsel %vm1240_vm9, %v363_v13, 0.0  ;;  %v382_v19 = vld [vmem:[%s1217_s6 + $0xd] sm:$0x7]  ;;  %378 = vst.msk [vmem:[#allocation2 + $0x20] sm:$0xff] %vm369_vm5, %v377_v18  ;;  %v361_v22 = vld [vmem:[#allocation3 + $0x2] sm:$0x1] }
  0x55   : > { %894 = vmatpush3.msra.mxu1 %v431_v57  ;;  %861 = vmatpush3.msra.mxu0 %v398_v56  ;;  %370 = vst.msk [vmem:[#allocation2 + $0x18] sm:$0xff] %vm369_vm5, %v368_v17  ;;  %v386_v20 = vsel %vm1245_vm11, %v382_v19, 0.0  ;;  %v833_v21 = vld [vmem:[%s1217_s6 + $0x1] ss:$2 sm:$0x7f]  ;;  %v427_v29 = vld [vmem:[#allocation6 + $0x108] sm:$0xff] }
  0x56   : > { %895 = vmatprep.subr.mxu1 %v446_v59  ;;  %862 = vmatprep.subr.mxu0 %v413_v58  ;;  %v428_v24 = vld [vmem:[#allocation6 + $0x110] sm:$0xff]  ;;  %v357_v25 = vrot.slane %v833_v21, 7  ;;  %362 = vst.msk [vmem:[#allocation2 + $0x10] sm:$0x1] %vm332_vm2, %v361_v22  ;;  %v410_v28 = vld [vmem:[#allocation6 + $0x80] sm:$0xff]  ;;  %v473_v37 = vld [vmem:[#allocation6 + $0x278] sm:$0xff] }
  0x57   : > { %896 = vmatpush3.msra.mxu1 %v430_v63  ;;  %863 = vmatpush3.msra.mxu0 %v397_v62  ;;  %388 = vst.msk [vmem:[#allocation3] sm:$0x7] %vm387_vm6, %v386_v20  ;;  %v394_v31 = vld [vmem:[#allocation6] sm:$0xff]  ;;  %v472_v39 = vld [vmem:[#allocation6 + $0x270] sm:$0xff]  ;;  %v471_v41 = vld [vmem:[#allocation6 + $0x268] sm:$0xff] }
  0x58   : > { %897 = vmatprep.subr.mxu1 %v445_v4  ;;  %864 = vmatprep.subr.mxu0 %v412_v3  ;;  %v359_v30 = vsel %vm353_vm12, %v357_v25, 0.0  ;;  %v442_v32 = vld [vmem:[#allocation6 + $0x180] sm:$0xff]  ;;  %v469_v43 = vld [vmem:[#allocation6 + $0x258] sm:$0xff]  ;;  %v468_v44 = vld [vmem:[#allocation6 + $0x250] sm:$0xff] }
  0x59   : > { %898 = vmatpush3.msra.mxu1 %v429_v11  ;;  %865 = vmatpush3.msra.mxu0 %v396_v10  ;;  %360 = vst.msk [vmem:[#allocation2 + $0x10] sm:$0xfe] %vm346_vm3, %v359_v30  ;;  %v390_v33 = vld [vmem:[#allocation2 + $0x8] sm:$0xff]  ;;  %v467_v45 = vld [vmem:[#allocation6 + $0x248] sm:$0xff]  ;;  %v464_v48 = vld [vmem:[#allocation6 + $0x230] sm:$0xff] }
  0x5a   : > { %899 = vmatprep.subr.mxu1 %v444_v15  ;;  %866 = vmatprep.subr.mxu0 %v411_v23  ;;  %v426_v34 = vld [vmem:[#allocation6 + $0x100] sm:$0xff]  ;;  %v389_v35 = vld [vmem:[#allocation2] sm:$0xff]  ;;  %v463_v49 = vld [vmem:[#allocation6 + $0x228] sm:$0xff] }
  0x5b   : > { %900 = vmatpush3.msra.mxu1 %v428_v24  ;;  %867 = vmatpush3.msra.mxu0 %v395_v26  ;;  %v470_v42 = vld [vmem:[#allocation6 + $0x260] sm:$0xff]  ;;  %v465_v47 = vld [vmem:[#allocation6 + $0x238] sm:$0xff]  ;;  %v460_v52 = vld [vmem:[#allocation6 + $0x210] sm:$0xff] }
  0x5c   : > { %901 = vmatprep.subr.mxu1 %v443_v27  ;;  %868 = vmatprep.subr.mxu0 %v410_v28  ;;  %v392_v36 = vld [vmem:[#allocation2 + $0x18] sm:$0xff]  ;;  %v466_v46 = vld [vmem:[#allocation6 + $0x240] sm:$0xff]  ;;  %v461_v51 = vld [vmem:[#allocation6 + $0x218] sm:$0xff] }
  0x5d   : > { %902 = vmatpush3.msra.mxu1 %v427_v29  ;;  %869 = vmatpush3.msra.mxu0 %v394_v31  ;;  %v462_v50 = vld [vmem:[#allocation6 + $0x220] sm:$0xff]  ;;  %v459_v53 = vld [vmem:[#allocation6 + $0x208] sm:$0xff]  ;;  %v393_v55 = vld [vmem:[#allocation2 + $0x20] sm:$0xff] }
  0x5e   : > { %545 = vmatprep.mubr.f32.mxu0 %v390_v33  ;;  %903 = vmatprep.subr.mxu1 %v442_v32  ;;  %v458_v54 = vld [vmem:[#allocation6 + $0x200] sm:$0xff]  ;;  %v835_v60 = vld [vmem:[%s1297_s3] ss:$0 sm:$0xff] }
  0x5f   : > { %546 = vmatmul.mubr.f32.vlgmr.msra.gmra.mxu0 %v389_v35  ;;  %925 = vmatprep.subr.mxu0 %v1107_v38 }
  0x60   : > { %904 = vmatpush3.msra.mxu1 %v426_v34  ;;  %615 = vmatprep.mubr.f32.mxu1 %v392_v36  ;;  %v391_v40 = vld [vmem:[#allocation2 + $0x10] sm:$0xff] }
  0x61   : > { %926 = vmatpush3.msra.mxu0 %v473_v37  ;;  %957 = vmatprep.mubr.msk.f32.mxu0 %vm1108_vm13, %v1107_v38 }
  0x62   : > { %927 = vmatprep.subr.mxu0 %v1107_v38  ;;  %616 = vmatmul.mubr.f32.vlgmr.msra.gmra.mxu1 %v391_v40 }
  0x63   : > { %928 = vmatpush3.msra.mxu0 %v472_v39 }
  0x64   : > { %929 = vmatprep.subr.mxu0 %v1107_v38 }
  0x65   : > { %930 = vmatpush3.msra.mxu0 %v471_v41 }
  0x66   : > { %931 = vmatprep.subr.mxu0 %v1107_v38 }
  0x67   : > { %932 = vmatpush3.msra.mxu0 %v470_v42 }
  0x68   : > { %933 = vmatprep.subr.mxu0 %v1107_v38 }
  0x69   : > { %934 = vmatpush3.msra.mxu0 %v469_v43 }
  0x6a   : > { %935 = vmatprep.subr.mxu0 %v1107_v38 }
  0x6b   : > { %936 = vmatpush3.msra.mxu0 %v468_v44 }
  0x6c   : > { %937 = vmatprep.subr.mxu0 %v1107_v38 }
  0x6d   : > { %938 = vmatpush3.msra.mxu0 %v467_v45 }
  0x6e   : > { %939 = vmatprep.subr.mxu0 %v1107_v38 }
  0x6f   : > { %940 = vmatpush3.msra.mxu0 %v466_v46 }
  0x70   : > { %941 = vmatprep.subr.mxu0 %v1107_v38 }
  0x71   : > { %942 = vmatpush3.msra.mxu0 %v465_v47 }
  0x72   : > { %943 = vmatprep.subr.mxu0 %v1107_v38 }
  0x73   : > { %944 = vmatpush3.msra.mxu0 %v464_v48 }
  0x74   : > { %945 = vmatprep.subr.mxu0 %v1107_v38 }
  0x75   : > { %946 = vmatpush3.msra.mxu0 %v463_v49 }
  0x76   : > { %947 = vmatprep.subr.mxu0 %v1107_v38 }
  0x77   : > { %948 = vmatpush3.msra.mxu0 %v462_v50 }
  0x78   : > { %949 = vmatprep.subr.mxu0 %v1107_v38 }
  0x79   : > { %950 = vmatpush3.msra.mxu0 %v461_v51 }
  0x7a   : > { %951 = vmatprep.subr.mxu0 %v1107_v38 }
  0x7b   : > { %952 = vmatpush3.msra.mxu0 %v460_v52 }
  0x7c   : > { %953 = vmatprep.subr.mxu0 %v1107_v38 }
  0x7d   : > { %954 = vmatpush3.msra.mxu0 %v459_v53 }
  0x7e   : > { %955 = vmatprep.subr.mxu0 %v1107_v38 }
  0x7f   : > { %956 = vmatpush3.msra.mxu0 %v458_v54 }
  0x80   : > { %958 = vmatmul.mubr.f32.vlgmr.msra.gmra.mxu0 %v393_v55 }
 0x11f   : > { %v870_v56 = vpop.f32.mrf.mxu0 }
 0x121   : > { %v871_v57 = vpop.f32.mrf.mxu0 }
 0x122   : > { %v905_v58 = vpop.f32.mrf.mxu1  ;;  %v872_v59 = vadd.f32 %v871_v57, %v870_v56 }
 0x124   : > { %v906_v61 = vpop.f32.mrf.mxu1  ;;  %v548_v62 = vadd.f32 %v872_v59, %v835_v60 }
 0x125   : > { %v907_v63 = vadd.f32 %v906_v61, %v905_v58 }
 0x127   : > { %v618_v0 = vadd.f32 %v907_v63, %v548_v62 }
 0x140   : > { %v687_v1 = vpop.f32.mrf.mxu0 }
 0x141   : > { %v688_v2 = vadd.f32 %v687_v1, %v618_v0 }
 0x142   : > { %v959_v3 = vpop.f32.mrf.mxu0 }
 0x143   : > { %691 = vst [vmem:[%s1212_s29] sm:$0xff] %v688_v2 }
 0x144 PF: > { %s21_s23 = sadd.s32 1, %s1100_s23   ;;  %s1306_s20 = smov %s1092_s22 }
 0x145   : > { %p18_p11 = scmp.ge.s32.totalorder %s21_s23, 6   ;;  %s1307_s21 = smov %s1096_s0 }
 0x146   : > { %s1308_s22 = smov %s1311_s25  ;;  %s1309_s0 = smov %s1315_s26 }
 0x147   :  { %20 = sbr.rel (!%p18_p11) target bundleno = 18 (0x12), region = 76 }
 0x14c   :  { %725 = vsyncpa [#allocation7], 1 }
 0x14d   :  { %727 = vsyncpa [#allocation7 + $0x1], 1 }

// kernel: tpu_custom_call.1
= control target key start
LH: loop header
LB: loop body
LE: loop exit
PB: predicated region body
PF: predicated region fallthrough
CT: control target
= control target key end

     0   :  { %s1294_s0 = inlined_call_operand.vmem [shape: s32[2], index: 0, kind: input, shape index: {}]   ;;  %s1295_s1 = inlined_call_operand.vmem [shape: f32[2,20,32], index: 1, kind: input, shape index: {}]   ;;  %s1296_s2 = inlined_call_operand.hbm [shape: f32[640,128], index: 2, kind: input, shape index: {}]   ;;  %s1297_s3 = inlined_call_operand.vmem [shape: f32[1,128], index: 3, kind: input, shape index: {}]   ;;  %s1298_s4 = inlined_call_operand.vmem [shape: f32[2,11,128], index: 4, kind: output, shape index: {}]  }
   0x1   :  { %s9_s17 = sshll.u32 %s1294_s0, 4  ;;  %s10_s17 = int_to_ptr.vmem [resolvable:$true] %s9_s17 }
   0x2   :  { %s1018_s18 = scalar_lea.vmem %s10_s17, 16  ;;  %p1023_p1 = scmp.lt.s32.totalorder %s10_s17, %s10_s17 }
   0x3   :  { %p1019_p0 = scmp.ne.s32.totalorder %s10_s17, %s1018_s18  ;;  %p1024_p2 = scmp.lt.s32.totalorder %s1018_s18, %s1018_s18 }
   0x5   :  { %p1025_p3 = por %p1024_p2, %p1023_p1 }
   0x7   :  { %p1026_p4 = pnand %p1025_p3, %p1019_p0 }
   0x9   :  { %1029 = shalt.err (!%p1026_p4)  }
   0xa   :  { %s1102_s19 = smov [#allocation5]  }
   0xb   :  { %12 = dma.vmem_to_smem %s10_s17, 16, %s1102_s19, [#allocation4] }
   0xc   :  { %1076 = dma.done.wait [#allocation4], 16 }
   0xd   :  { %1077 = vsyncadd [#allocation4], 4294967280 }
   0xe   :  { %14 = sfence }
   0xf   :  { %15 = vsyncpa [#allocation7], 0  ;;  %s1137_s20 = smov 0   ;;  %s1139_s21 = smov 0  }
  0x10   :  { %s1141_s22 = smov 0   ;;  %s1143_s0 = smov 0  }
  0x11   :  { %s1145_s23 = smov 0  }
  0x12 LB: > { %s818_s24 = sadd.s32 4294967295, %s1100_s23   ;;  %s33_s25 = sadd.s32 1, %s1092_s22  ;;  %s1100_s23 = sphi %s1145_s23, %s21_s23   ;;  %s1096_s0 = sphi %s1143_s0, %s1309_s0   ;;  %s1092_s22 = sphi %s1141_s22, %s1308_s22   ;;  %s1088_s21 = sphi %s1139_s21, %s1307_s21   ;;  %s1084_s20 = sphi %s1137_s20, %s1306_s20  }
  0x13   : > { %p34_p5 = scmp.ge.s32.totalorder %s33_s25, 2  ;;  %s36_s26 = sadd.s32 1, %s1096_s0 }
  0x14   : > { %p820_p6 = scmp.ge.s32.totalorder %s1100_s23, 1  ;;  %p159_p7 = scmp.lt.s32.totalorder %s1100_s23, 5 }
  0x15   : > { %s1311_s25 = smov (%p34_p5, %s33_s25), 0  ;;  %s1313_s26 = smov (!%p34_p5, %s36_s26), %s1096_s0 }
  0x16   : > { %p1170_p8 = pnand %p820_p6, %p159_p7  ;;  %p38_p9 = scmp.ge.s32.totalorder %s1313_s26, 2 }
  0x17   : > { %p1174_p10 = scmp.eq.s32.totalorder %s818_s24, 0  ;;  %s1103_s29 = smov [#allocation6]  }
  0x18   : > { %p965_p11 = pneg %p1170_p8  ;;  %s1315_s26 = smov (%p38_p9, %s1313_s26), 0 }
  0x19   : > { %s173_s30 = sshll.u32 %s1103_s29, 4  ;;  %s174_s30 = int_to_ptr.vmem [resolvable:$true] %s173_s30 }
  0x1a   : > { %p1184_p12 = pnand %p1174_p10, %p965_p11  ;;  %s1041_s6 = scalar_lea.vmem %s174_s30, 10240 }
  0x1b   : > { %p1042_p0 = scmp.ne.s32.totalorder %s174_s30, %s1041_s6  ;;  %p1049_p3 = scmp.lt.s32.totalorder %s174_s30, %s174_s30 }
  0x1c   : > { %p1032_p13 = pneg %p1184_p12  ;;  %p1050_p4 = scmp.lt.s32.totalorder %s1041_s6, %s1041_s6 }
  0x1e   : > { %p1044_p1 = pnand %p1042_p0, %p1032_p13  ;;  %p1051_p5 = por %p1050_p4, %p1049_p3 }
  0x20   : > { %p1045_p2 = pneg %p1044_p1 }
  0x22   : > { %p1052_p6 = pnand %p1051_p5, %p1045_p2 }
  0x24   : > { %1055 = shalt.err (!%p1052_p6)
}
  0x25   : > { %s1104_s7 = smov 128   ;;  %s1105_s8 = smov 8  }
  0x26   : > { %968 = dma.hbm_to_vmem [thread:$0]  (!%p1184_p12), %s1296_s2, 10240, %s174_s30, [#allocation7], %s1104_s7, %s1104_s7, %s1105_s8  }
  0x27   : > { %220 = sbr.rel (%p1170_p8) target bundleno = 324 (0x144), region = 32 }
  0x2c   : > { %1079 = dma.done.wait (%p1174_p10), [#allocation7], 10240  }
  0x2d   : > { %1081 = vsyncadd (%p1174_p10), [#allocation7], 4294957056  ;;  %p263_p7 = scmp.lt.s32.totalorder %s1084_s20, 1  ;;  %p270_p9 = scmp.lt.s32.totalorder %s1088_s21, 1 }
  0x2e   : > { %s1204_s11 = sld [smem:[#allocation5 + %s1088_s21]]  ;;  %s830_s12 = sshll.u32 %s1084_s20, 4 }
  0x2f   : > { %s264_s13 = scalar_select %p263_p7, %s1084_s20, 1 }
  0x30   : > { %s1317_s21 = smov (!%p270_p9, %s1088_s21), 1  ;;  %p831_p10 = scmp.ne.s32.totalorder %s1084_s20, 0 }
  0x31   : > { %s826_s14 = sshll.u32 %s264_s13, 1  ;;  %s960_s15 = smul.u32 3, %s1317_s21 }
  0x32   : > { %p272_p8 = scmp.lt.s32.totalorder %s826_s14, 2  ;;  %s828_s16 = sshll.u32 %s1317_s21, 1 }
  0x33   : > { %s296_s17 = sadd.s32 %s828_s16, %s264_s13  ;;  %304 = sbr.rel (%p831_p10) target bundleno = 61 (0x3d), region = 40 }
  0x34   : > { %s1319_s14 = smov (!%p272_p8, %s826_s14), 2  ;;  %s829_s19 = sshll.u32 %s296_s17, 3 }
  0x35   : > { %s275_s18 = sadd.s32 %s960_s15, %s1319_s14  ;;  %s1212_s29 = scalar_lea.vmem %s1298_s4, %s829_s19 }
  0x36   : > { %s827_s24 = sshll.u32 %s275_s18, 3 }
  0x37   : > { %s1217_s6 = scalar_lea.vmem %s1295_s1, %s827_s24 }
  0x38   : > { %vm305_vm0 = vcmask 256000   ;;  %vm307_vm1 = vcmask 1047808   ;;  %v1106_v0 = vmov 0.0  }
  0x39   : > { %306 = vst.msk [vmem:[#allocation3] sm:$0x7] %vm305_vm0, %v1106_v0 }
  0x3a   : > { %308 = vst.msk [vmem:[#allocation2] sm:$0xff] %vm307_vm1, %v1106_v0  ;;  %309 = vst.msk [vmem:[#allocation2 + $0x8] sm:$0xff] %vm307_vm1, %v1106_v0 }
  0x3b   : > { %310 = vst.msk [vmem:[#allocation2 + $0x10] sm:$0xff] %vm307_vm1, %v1106_v0  ;;  %311 = vst.msk [vmem:[#allocation2 + $0x18] sm:$0xff] %vm307_vm1, %v1106_v0 }
  0x3c   : > { %312 = vst.msk [vmem:[#allocation2 + $0x20] sm:$0xff] %vm307_vm1, %v1106_v0 }
  0x3d PF: > { %v425_v1 = vld [vmem:[#allocation6 + $0xf8] sm:$0xff]  ;;  %v424_v3 = vld [vmem:[#allocation6 + $0xf0] sm:$0xff]  ;;  %v423_v7 = vld [vmem:[#allocation6 + $0xe8] sm:$0xff]  ;;  %v313_v14 = vlaneseq  ;;  %s1222_s21 = sadd.s32 13, %s830_s12  ;;  %v316_v35 = vstv %s830_s12  ;;  %s337_s7 = sadd.s32 2, %s1204_s11  ;;  %vm332_vm2 = vcmask 253952   ;;  %v364_v52 = vstv %s1204_s11 }
  0x3e   : > { %v409_v2 = vld [vmem:[#allocation6 + $0x78] sm:$0xff]  ;;  %838 = vmatprep.subr.mxu0 %v425_v1  ;;  %v408_v5 = vld [vmem:[#allocation6 + $0x70] sm:$0xff]  ;;  %v407_v9 = vld [vmem:[#allocation6 + $0x68] sm:$0xff]  ;;  %s320_s8 = sadd.s32 3, %s1204_s11  ;;  %s372_s9 = sadd.s32 4294967295, %s1204_s11  ;;  %v380_v40 = vstv %s1222_s21  ;;  %v338_v47 = vstv %s337_s7  ;;  %vm346_vm3 = vcmask 261121  }
  0x3f   : > { %v457_v4 = vld [vmem:[#allocation6 + $0x1f8] sm:$0xff]  ;;  %839 = vmatpush3.msra.mxu0 %v409_v2  ;;  %v456_v8 = vld [vmem:[#allocation6 + $0x1f0] sm:$0xff]  ;;  %v455_v11 = vld [vmem:[#allocation6 + $0x1e8] sm:$0xff]  ;;  %v314_v23 = vshrl.u32 %v313_v14, 7  ;;  %vm329_vm4 = vcmask 261122   ;;  %v321_v51 = vstv %s320_s8  ;;  %v373_v53 = vstv %s372_s9  ;;  %s351_s20 = sadd.s32 1, %s1204_s11 }
  0x40   : > { %v441_v6 = vld [vmem:[#allocation6 + $0x178] sm:$0xff]  ;;  %873 = vmatprep.subr.mxu1 %v457_v4  ;;  %840 = vmatprep.subr.mxu0 %v424_v3  ;;  %v440_v10 = vld [vmem:[#allocation6 + $0x170] sm:$0xff]  ;;  %v422_v12 = vld [vmem:[#allocation6 + $0xe0] sm:$0xff]  ;;  %vm369_vm5 = vcmask 261120   ;;  %vm387_vm6 = vcmask 256000   ;;  %vm1108_vm13 = vmmov 0  }
  0x41   : > { %874 = vmatpush3.msra.mxu1 %v441_v6  ;;  %841 = vmatpush3.msra.mxu0 %v408_v5  ;;  %v439_v13 = vld [vmem:[#allocation6 + $0x168] sm:$0xff]  ;;  %v406_v15 = vld [vmem:[#allocation6 + $0x60] sm:$0xff]  ;;  %v421_v17 = vld [vmem:[#allocation6 + $0xd8] sm:$0xff]  ;;  %v315_v32 = vmul.u32 2, %v314_v23  ;;  %v381_v54 = vadd.s32 %v380_v40, %v314_v23 }
  0x42   : > { %875 = vmatprep.subr.mxu1 %v456_v8  ;;  %842 = vmatprep.subr.mxu0 %v423_v7  ;;  %v454_v16 = vld [vmem:[#allocation6 + $0x1e0] sm:$0xff]  ;;  %v405_v19 = vld [vmem:[#allocation6 + $0x58] sm:$0xff]  ;;  %v420_v21 = vld [vmem:[#allocation6 + $0xd0] sm:$0xff] }
  0x43   : > { %876 = vmatpush3.msra.mxu1 %v440_v10  ;;  %843 = vmatpush3.msra.mxu0 %v407_v9  ;;  %v438_v18 = vld [vmem:[#allocation6 + $0x160] sm:$0xff]  ;;  %v453_v20 = vld [vmem:[#allocation6 + $0x1d8] sm:$0xff]  ;;  %v404_v24 = vld [vmem:[#allocation6 + $0x50] sm:$0xff]  ;;  %v1230_v43 = vadd.s32 %v316_v35, %v315_v32  ;;  %vm1245_vm11 = vcmp.lt.s32.totalorder %v381_v54, %v364_v52  ;;  %v352_v9 = vstv %s351_s20 }
  0x44   : > { %877 = vmatprep.subr.mxu1 %v455_v11  ;;  %844 = vmatprep.subr.mxu0 %v422_v12  ;;  %v437_v22 = vld [vmem:[#allocation6 + $0x158] sm:$0xff]  ;;  %v452_v25 = vld [vmem:[#allocation6 + $0x1d0] sm:$0xff]  ;;  %v419_v26 = vld [vmem:[#allocation6 + $0xc8] sm:$0xff] }
  0x45   : > { %878 = vmatpush3.msra.mxu1 %v439_v13  ;;  %845 = vmatpush3.msra.mxu0 %v406_v15  ;;  %v436_v27 = vld [vmem:[#allocation6 + $0x150] sm:$0xff]  ;;  %v403_v28 = vld [vmem:[#allocation6 + $0x48] sm:$0xff]  ;;  %v418_v30 = vld [vmem:[#allocation6 + $0xc0] sm:$0xff]  ;;  %vm339_vm7 = vcmp.lt.s32.totalorder %v1230_v43, %v338_v47  ;;  %vm322_vm8 = vcmp.lt.s32.totalorder %v1230_v43, %v321_v51  ;;  %vm1240_vm9 = vcmp.lt.s32.totalorder %v1230_v43, %v364_v52 }
  0x46   : > { %879 = vmatprep.subr.mxu1 %v454_v16  ;;  %846 = vmatprep.subr.mxu0 %v421_v17  ;;  %v451_v29 = vld [vmem:[#allocation6 + $0x1c8] sm:$0xff]  ;;  %v402_v33 = vld [vmem:[#allocation6 + $0x40] sm:$0xff]  ;;  %v417_v36 = vld [vmem:[#allocation6 + $0xb8] sm:$0xff]  ;;  %vm374_vm10 = vcmp.lt.s32.totalorder %v1230_v43, %v373_v53  ;;  %vm353_vm12 = vcmp.lt.s32.totalorder %v1230_v43, %v352_v9 }
  0x47   : > { %880 = vmatpush3.msra.mxu1 %v438_v18  ;;  %847 = vmatpush3.msra.mxu0 %v405_v19  ;;  %v435_v31 = vld [vmem:[#allocation6 + $0x148] sm:$0xff]  ;;  %v450_v34 = vld [vmem:[#allocation6 + $0x1c0] sm:$0xff]  ;;  %v401_v38 = vld [vmem:[#allocation6 + $0x38] sm:$0xff] }
  0x48   : > { %881 = vmatprep.subr.mxu1 %v453_v20  ;;  %848 = vmatprep.subr.mxu0 %v420_v21  ;;  %v434_v37 = vld [vmem:[#allocation6 + $0x140] sm:$0xff]  ;;  %v449_v39 = vld [vmem:[#allocation6 + $0x1b8] sm:$0xff]  ;;  %v416_v41 = vld [vmem:[#allocation6 + $0xb0] sm:$0xff] }
  0x49   : > { %882 = vmatpush3.msra.mxu1 %v437_v22  ;;  %849 = vmatpush3.msra.mxu0 %v404_v24  ;;  %v433_v42 = vld [vmem:[#allocation6 + $0x138] sm:$0xff]  ;;  %v400_v44 = vld [vmem:[#allocation6 + $0x30] sm:$0xff]  ;;  %v415_v45 = vld [vmem:[#allocation6 + $0xa8] sm:$0xff] }
  0x4a   : > { %883 = vmatprep.subr.mxu1 %v452_v25  ;;  %850 = vmatprep.subr.mxu0 %v419_v26  ;;  %v448_v46 = vld [vmem:[#allocation6 + $0x1b0] sm:$0xff]  ;;  %v399_v48 = vld [vmem:[#allocation6 + $0x28] sm:$0xff]  ;;  %v414_v50 = vld [vmem:[#allocation6 + $0xa0] sm:$0xff] }
  0x4b   : > { %884 = vmatpush3.msra.mxu1 %v436_v27  ;;  %851 = vmatpush3.msra.mxu0 %v403_v28  ;;  %v432_v49 = vld [vmem:[#allocation6 + $0x130] sm:$0xff]  ;;  %v447_v55 = vld [vmem:[#allocation6 + $0x1a8] sm:$0xff]  ;;  %v398_v56 = vld [vmem:[#allocation6 + $0x20] sm:$0xff] }
  0x4c   : > { %885 = vmatprep.subr.mxu1 %v451_v29  ;;  %852 = vmatprep.subr.mxu0 %v418_v30  ;;  %v431_v57 = vld [vmem:[#allocation6 + $0x128] sm:$0xff]  ;;  %v413_v58 = vld [vmem:[#allocation6 + $0x98] sm:$0xff]  ;;  %v446_v59 = vld [vmem:[#allocation6 + $0x1a0] sm:$0xff] }
  0x4d   : > { %886 = vmatpush3.msra.mxu1 %v435_v31  ;;  %853 = vmatpush3.msra.mxu0 %v402_v33  ;;  %v336_v60 = vld [vmem:[%s1217_s6] ss:$2 sm:$0x7f]  ;;  %v348_v61 = vld [vmem:[#allocation3 + $0x1] sm:$0x1]  ;;  %v411_v23 = vld [vmem:[#allocation6 + $0x88] sm:$0xff] }
  0x4e   : > { %887 = vmatprep.subr.mxu1 %v450_v34  ;;  %854 = vmatprep.subr.mxu0 %v417_v36  ;;  %v397_v62 = vld [vmem:[#allocation6 + $0x18] sm:$0xff]  ;;  %v430_v63 = vld [vmem:[#allocation6 + $0x120] sm:$0xff]  ;;  %v343_v0 = vrot.slane %v336_v60, 7  ;;  %349 = vst.msk [vmem:[#allocation2 + $0x8] sm:$0x1] %vm332_vm2, %v348_v61  ;;  %v412_v3 = vld [vmem:[#allocation6 + $0x90] sm:$0xff] }
  0x4f   : > { %888 = vmatpush3.msra.mxu1 %v434_v37  ;;  %855 = vmatpush3.msra.mxu0 %v401_v38  ;;  %v832_v1 = vld [vmem:[%s1217_s6 + $0x1] ss:$2 sm:$0x3f]  ;;  %v331_v6 = vld [vmem:[#allocation3] sm:$0x1]  ;;  %v395_v26 = vld [vmem:[#allocation6 + $0x8] sm:$0xff] }
  0x50   : > { %889 = vmatprep.subr.mxu1 %v449_v39  ;;  %856 = vmatprep.subr.mxu0 %v416_v41  ;;  %v445_v4 = vld [vmem:[#allocation6 + $0x198] sm:$0xff]  ;;  %v326_v5 = vrot.slane %v832_v1, 6  ;;  %v396_v10 = vld [vmem:[#allocation6 + $0x10] sm:$0xff]  ;;  %v345_v12 = vsel %vm339_vm7, %v343_v0, 0.0  ;;  %333 = vst.msk [vmem:[#allocation2] sm:$0x1] %vm332_vm2, %v331_v6 }
  0x51   : > { %890 = vmatpush3.msra.mxu1 %v433_v42  ;;  %857 = vmatpush3.msra.mxu0 %v400_v44  ;;  %v334_v7 = vld [vmem:[#allocation3 + $0x2] sm:$0x1]  ;;  %v834_v14 = vld [vmem:[%s1217_s6 + $0x1] ss:$2 sm:$0xff]  ;;  %347 = vst.msk [vmem:[#allocation2 + $0x8] sm:$0xfe] %vm346_vm3, %v345_v12 }
  0x52   : > { %891 = vmatprep.subr.mxu1 %v448_v46  ;;  %858 = vmatprep.subr.mxu0 %v415_v45  ;;  %v429_v11 = vld [vmem:[#allocation6 + $0x118] sm:$0xff]  ;;  %335 = vst.msk [vmem:[#allocation2 + $0x1] sm:$0x1] %vm332_vm2, %v334_v7  ;;  %v444_v15 = vld [vmem:[#allocation6 + $0x190] sm:$0xff]  ;;  %v328_v16 = vsel %vm322_vm8, %v326_v5, 0.0  ;;  %v377_v18 = vsel %vm374_vm10, %v834_v14, 0.0 }
  0x53   : > { %892 = vmatpush3.msra.mxu1 %v432_v49  ;;  %859 = vmatpush3.msra.mxu0 %v399_v48  ;;  %v363_v13 = vld [vmem:[%s1217_s6] ss:$2 sm:$0xff]  ;;  %330 = vst.msk [vmem:[#allocation2] sm:$0xfc] %vm329_vm4, %v328_v16  ;;  %v443_v27 = vld [vmem:[#allocation6 + $0x188] sm:$0xff]  ;;  %v1107_v38 = vmov 0.0  }
  0x54   : > { %893 = vmatprep.subr.mxu1 %v447_v55  ;;  %860 = vmatprep.subr.mxu0 %v414_v50  ;;  %v368_v17 = vsel %vm1240_vm9, %v363_v13, 0.0  ;;  %v382_v19 = vld [vmem:[%s1217_s6 + $0xd] sm:$0x7]  ;;  %378 = vst.msk [vmem:[#allocation2 + $0x20] sm:$0xff] %vm369_vm5, %v377_v18  ;;  %v361_v22 = vld [vmem:[#allocation3 + $0x2] sm:$0x1] }
  0x55   : > { %894 = vmatpush3.msra.mxu1 %v431_v57  ;;  %861 = vmatpush3.msra.mxu0 %v398_v56  ;;  %370 = vst.msk [vmem:[#allocation2 + $0x18] sm:$0xff] %vm369_vm5, %v368_v17  ;;  %v386_v20 = vsel %vm1245_vm11, %v382_v19, 0.0  ;;  %v833_v21 = vld [vmem:[%s1217_s6 + $0x1] ss:$2 sm:$0x7f]  ;;  %v427_v29 = vld [vmem:[#allocation6 + $0x108] sm:$0xff] }
  0x56   : > { %895 = vmatprep.subr.mxu1 %v446_v59  ;;  %862 = vmatprep.subr.mxu0 %v413_v58  ;;  %v428_v24 = vld [vmem:[#allocation6 + $0x110] sm:$0xff]  ;;  %v357_v25 = vrot.slane %v833_v21, 7  ;;  %362 = vst.msk [vmem:[#allocation2 + $0x10] sm:$0x1] %vm332_vm2, %v361_v22  ;;  %v410_v28 = vld [vmem:[#allocation6 + $0x80] sm:$0xff]  ;;  %v473_v37 = vld [vmem:[#allocation6 + $0x278] sm:$0xff] }
  0x57   : > { %896 = vmatpush3.msra.mxu1 %v430_v63  ;;  %863 = vmatpush3.msra.mxu0 %v397_v62  ;;  %388 = vst.msk [vmem:[#allocation3] sm:$0x7] %vm387_vm6, %v386_v20  ;;  %v394_v31 = vld [vmem:[#allocation6] sm:$0xff]  ;;  %v472_v39 = vld [vmem:[#allocation6 + $0x270] sm:$0xff]  ;;  %v471_v41 = vld [vmem:[#allocation6 + $0x268] sm:$0xff] }
  0x58   : > { %897 = vmatprep.subr.mxu1 %v445_v4  ;;  %864 = vmatprep.subr.mxu0 %v412_v3  ;;  %v359_v30 = vsel %vm353_vm12, %v357_v25, 0.0  ;;  %v442_v32 = vld [vmem:[#allocation6 + $0x180] sm:$0xff]  ;;  %v469_v43 = vld [vmem:[#allocation6 + $0x258] sm:$0xff]  ;;  %v468_v44 = vld [vmem:[#allocation6 + $0x250] sm:$0xff] }
  0x59   : > { %898 = vmatpush3.msra.mxu1 %v429_v11  ;;  %865 = vmatpush3.msra.mxu0 %v396_v10  ;;  %360 = vst.msk [vmem:[#allocation2 + $0x10] sm:$0xfe] %vm346_vm3, %v359_v30  ;;  %v390_v33 = vld [vmem:[#allocation2 + $0x8] sm:$0xff]  ;;  %v467_v45 = vld [vmem:[#allocation6 + $0x248] sm:$0xff]  ;;  %v464_v48 = vld [vmem:[#allocation6 + $0x230] sm:$0xff] }
  0x5a   : > { %899 = vmatprep.subr.mxu1 %v444_v15  ;;  %866 = vmatprep.subr.mxu0 %v411_v23  ;;  %v426_v34 = vld [vmem:[#allocation6 + $0x100] sm:$0xff]  ;;  %v389_v35 = vld [vmem:[#allocation2] sm:$0xff]  ;;  %v463_v49 = vld [vmem:[#allocation6 + $0x228] sm:$0xff] }
  0x5b   : > { %900 = vmatpush3.msra.mxu1 %v428_v24  ;;  %867 = vmatpush3.msra.mxu0 %v395_v26  ;;  %v470_v42 = vld [vmem:[#allocation6 + $0x260] sm:$0xff]  ;;  %v465_v47 = vld [vmem:[#allocation6 + $0x238] sm:$0xff]  ;;  %v460_v52 = vld [vmem:[#allocation6 + $0x210] sm:$0xff] }
  0x5c   : > { %901 = vmatprep.subr.mxu1 %v443_v27  ;;  %868 = vmatprep.subr.mxu0 %v410_v28  ;;  %v392_v36 = vld [vmem:[#allocation2 + $0x18] sm:$0xff]  ;;  %v466_v46 = vld [vmem:[#allocation6 + $0x240] sm:$0xff]  ;;  %v461_v51 = vld [vmem:[#allocation6 + $0x218] sm:$0xff] }
  0x5d   : > { %902 = vmatpush3.msra.mxu1 %v427_v29  ;;  %869 = vmatpush3.msra.mxu0 %v394_v31  ;;  %v462_v50 = vld [vmem:[#allocation6 + $0x220] sm:$0xff]  ;;  %v459_v53 = vld [vmem:[#allocation6 + $0x208] sm:$0xff]  ;;  %v393_v55 = vld [vmem:[#allocation2 + $0x20] sm:$0xff] }
  0x5e   : > { %545 = vmatprep.mubr.f32.mxu0 %v390_v33  ;;  %903 = vmatprep.subr.mxu1 %v442_v32  ;;  %v458_v54 = vld [vmem:[#allocation6 + $0x200] sm:$0xff]  ;;  %v835_v60 = vld [vmem:[%s1297_s3] ss:$0 sm:$0xff] }
  0x5f   : > { %546 = vmatmul.mubr.f32.vlgmr.msra.gmra.mxu0 %v389_v35  ;;  %925 = vmatprep.subr.mxu0 %v1107_v38 }
  0x60   : > { %904 = vmatpush3.msra.mxu1 %v426_v34  ;;  %615 = vmatprep.mubr.f32.mxu1 %v392_v36  ;;  %v391_v40 = vld [vmem:[#allocation2 + $0x10] sm:$0xff] }
  0x61   : > { %926 = vmatpush3.msra.mxu0 %v473_v37  ;;  %957 = vmatprep.mubr.msk.f32.mxu0 %vm1108_vm13, %v1107_v38 }
  0x62   : > { %927 = vmatprep.subr.mxu0 %v1107_v38  ;;  %616 = vmatmul.mubr.f32.vlgmr.msra.gmra.mxu1 %v391_v40 }
  0x63   : > { %928 = vmatpush3.msra.mxu0 %v472_v39 }
  0x64   : > { %929 = vmatprep.subr.mxu0 %v1107_v38 }
  0x65   : > { %930 = vmatpush3.msra.mxu0 %v471_v41 }
  0x66   : > { %931 = vmatprep.subr.mxu0 %v1107_v38 }
  0x67   : > { %932 = vmatpush3.msra.mxu0 %v470_v42 }
  0x68   : > { %933 = vmatprep.subr.mxu0 %v1107_v38 }
  0x69   : > { %934 = vmatpush3.msra.mxu0 %v469_v43 }
  0x6a   : > { %935 = vmatprep.subr.mxu0 %v1107_v38 }
  0x6b   : > { %936 = vmatpush3.msra.mxu0 %v468_v44 }
  0x6c   : > { %937 = vmatprep.subr.mxu0 %v1107_v38 }
  0x6d   : > { %938 = vmatpush3.msra.mxu0 %v467_v45 }
  0x6e   : > { %939 = vmatprep.subr.mxu0 %v1107_v38 }
  0x6f   : > { %940 = vmatpush3.msra.mxu0 %v466_v46 }
  0x70   : > { %941 = vmatprep.subr.mxu0 %v1107_v38 }
  0x71   : > { %942 = vmatpush3.msra.mxu0 %v465_v47 }
  0x72   : > { %943 = vmatprep.subr.mxu0 %v1107_v38 }
  0x73   : > { %944 = vmatpush3.msra.mxu0 %v464_v48 }
  0x74   : > { %945 = vmatprep.subr.mxu0 %v1107_v38 }
  0x75   : > { %946 = vmatpush3.msra.mxu0 %v463_v49 }
  0x76   : > { %947 = vmatprep.subr.mxu0 %v1107_v38 }
  0x77   : > { %948 = vmatpush3.msra.mxu0 %v462_v50 }
  0x78   : > { %949 = vmatprep.subr.mxu0 %v1107_v38 }
  0x79   : > { %950 = vmatpush3.msra.mxu0 %v461_v51 }
  0x7a   : > { %951 = vmatprep.subr.mxu0 %v1107_v38 }
  0x7b   : > { %952 = vmatpush3.msra.mxu0 %v460_v52 }
  0x7c   : > { %953 = vmatprep.subr.mxu0 %v1107_v38 }
  0x7d   : > { %954 = vmatpush3.msra.mxu0 %v459_v53 }
  0x7e   : > { %955 = vmatprep.subr.mxu0 %v1107_v38 }
  0x7f   : > { %956 = vmatpush3.msra.mxu0 %v458_v54 }
  0x80   : > { %958 = vmatmul.mubr.f32.vlgmr.msra.gmra.mxu0 %v393_v55 }
 0x11f   : > { %v870_v56 = vpop.f32.mrf.mxu0 }
 0x121   : > { %v871_v57 = vpop.f32.mrf.mxu0 }
 0x122   : > { %v905_v58 = vpop.f32.mrf.mxu1  ;;  %v872_v59 = vadd.f32 %v871_v57, %v870_v56 }
 0x124   : > { %v906_v61 = vpop.f32.mrf.mxu1  ;;  %v548_v62 = vadd.f32 %v872_v59, %v835_v60 }
 0x125   : > { %v907_v63 = vadd.f32 %v906_v61, %v905_v58 }
 0x127   : > { %v618_v0 = vadd.f32 %v907_v63, %v548_v62 }
 0x140   : > { %v687_v1 = vpop.f32.mrf.mxu0 }
 0x141   : > { %v688_v2 = vadd.f32 %v687_v1, %v618_v0 }
 0x142   : > { %v959_v3 = vpop.f32.mrf.mxu0 }
 0x143   : > { %691 = vst [vmem:[%s1212_s29] sm:$0xff] %v688_v2 }
 0x144 PF: > { %s21_s23 = sadd.s32 1, %s1100_s23   ;;  %s1306_s20 = smov %s1092_s22 }
 0x145   : > { %p18_p11 = scmp.ge.s32.totalorder %s21_s23, 6   ;;  %s1307_s21 = smov %s1096_s0 }
 0x146   : > { %s1308_s22 = smov %s1311_s25  ;;  %s1309_s0 = smov %s1315_s26 }
 0x147   :  { %20 = sbr.rel (!%p18_p11) target bundleno = 18 (0x12), region = 76 }
 0x14c   :  { %725 = vsyncpa [#allocation7], 1 }
 0x14d   :  { %727 = vsyncpa [#allocation7 + $0x1], 1 }

</bundles_post_ra>
